<compile_context>
chip_gen: v7x
topology: tpu7x:2x2x1
jax: 0.10.0
libtpu: 0.0.40
codegen_flags: <defaults>
</compile_context>

<pallas_src>
import jax
import jax.numpy as jnp
from jax.experimental import pallas as pl
from jax.experimental.pallas import tpu as pltpu

_BN_EPS = 1e-5


def _make_banded(w, W):
    """(3,3,Cin,Cout) conv weight -> (3, (W+2)*Cin, W*Cout) banded matmul weight.

    B[dy, (x+dx)*Cin + ci, x*Cout + co] = w[dy, dx, ci, co], zero elsewhere.
    Multiplying a lane-dense padded row slab (N*H, (W+2)*Cin) by B[dy] and
    summing over dy performs the whole 3x3 'same' convolution lane-dense.
    """
    kH, kW, Cin, Cout = w.shape
    L = (W + kW - 1) * Cin                       # (W+2)*Cin padded-row lanes
    wk = w.reshape(kH, kW * Cin, Cout)
    row0 = jnp.concatenate(
        [wk, jnp.zeros((kH, L - kW * Cin, Cout), w.dtype)], axis=1)  # x = 0 row
    # Column block x is row0 shifted down by x*Cin rows (tail zeros absorb it).
    idx = (jnp.arange(L)[None, :] - Cin * jnp.arange(W)[:, None]) % L  # (W, L)
    banded = row0[:, idx, :]                      # (kH, W, L, Cout)
    return jnp.transpose(banded, (0, 2, 1, 3)).reshape(kH, L, W * Cout)


def double_conv_pallas(x_nhwc, params1, params2):
    """x_nhwc: (N, H, W, Cin) f32. params = (w(3,3,ci,co), bias, gamma, beta)."""
    N, H, W, Cin = x_nhwc.shape
    w1, _b1, g1, beta1 = params1   # conv bias unused: cancelled by BN mean sub
    w2, _b2, g2, beta2 = params2
    Cmid = w1.shape[-1]
    Cout = w2.shape[-1]
    f32 = jnp.float32

    # --- host/XLA-side precompute (tiny): banded conv weights, lane-dense BN
    # affine params, and the per-block "group-sum" fold matrices.
    bw1 = _make_banded(w1.astype(f32), W)                 # (3,(W+2)*Cin, W*Cmid)
    bw2 = _make_banded(w2.astype(f32), W)                 # (3,(W+2)*Cmid,W*Cout)
    gm1 = jnp.kron(jnp.ones((W, W), f32), jnp.eye(Cmid, dtype=f32))  # (W*Cmid,)^2
    gm2 = jnp.kron(jnp.ones((W, W), f32), jnp.eye(Cout, dtype=f32))  # (W*Cout,)^2
    g1l = jnp.tile(g1.astype(f32), W).reshape(1, W * Cmid)
    b1l = jnp.tile(beta1.astype(f32), W).reshape(1, W * Cmid)
    g2l = jnp.tile(g2.astype(f32), W).reshape(1, W * Cout)
    b2l = jnp.tile(beta2.astype(f32), W).reshape(1, W * Cout)
    x_ld = x_nhwc.astype(f32).reshape(N, H, W * Cin)      # lane-dense input

    rows = N * H
    inv_m = 1.0 / (N * H * W)

    def kernel(x_ref, bw1_ref, g1_ref, b1_ref, gm1_ref,
               bw2_ref, g2_ref, b2_ref, gm2_ref,
               o_ref, xpad_ref, midpad_ref):
        def zero_halo(pad_ref, c):
            """Zero only the 1-wide halo ring (interior is overwritten below)."""
            lp = pad_ref.shape[-1]                 # (W+2)*c lanes
            pad_ref[:, 0:1, :] = jnp.zeros((N, 1, lp), f32)
            pad_ref[:, H + 1:H + 2, :] = jnp.zeros((N, 1, lp), f32)
            pad_ref[:, 1:H + 1, 0:c] = jnp.zeros((N, H, c), f32)
            pad_ref[:, 1:H + 1, lp - c:lp] = jnp.zeros((N, H, c), f32)

        def conv_bn_relu(pad_ref, bw_ref, gl_ref, bl_ref, gm_ref):
            lsrc = pad_ref.shape[-1]               # (W+2)*c_in lanes
            wc = bw_ref.shape[-1]                  # W*c_out lanes
            # 3x3 'same' conv as 3 lane-dense banded matmuls (one per dy),
            # accumulated back-to-back into one f32 accumulator.
            acc = jnp.zeros((rows, wc), f32)
            for dy in range(3):
                slab = pad_ref[:, dy:dy + H, :].reshape(rows, lsrc)
                acc = acc + jnp.dot(slab, bw_ref[dy],
                                    preferred_element_type=f32)
            # Conv bias intentionally omitted: the batch-mean subtraction below
            # cancels a per-channel constant bias exactly.
            # Training-mode BatchNorm2d (biased variance), kept lane-dense:
            # gm folds the W lane groups per channel and re-broadcasts.
            mean_l = jnp.dot(jnp.sum(acc, axis=0, keepdims=True), gm_ref[...],
                             preferred_element_type=f32) * inv_m
            cen = acc - mean_l
            var_l = jnp.dot(jnp.sum(cen * cen, axis=0, keepdims=True),
                            gm_ref[...], preferred_element_type=f32) * inv_m
            scale_l = gl_ref[...] * jax.lax.rsqrt(var_l + _BN_EPS)
            return jnp.maximum(cen * scale_l + bl_ref[...], 0.0)  # (rows, wc)

        # ---- block 1 -------------------------------------------------------
        zero_halo(xpad_ref, Cin)
        xpad_ref[:, 1:H + 1, Cin:(W + 1) * Cin] = x_ref[...]
        y1 = conv_bn_relu(xpad_ref, bw1_ref, g1_ref, b1_ref, gm1_ref)

        # ---- block 2 (intermediate never leaves VMEM) -----------------------
        zero_halo(midpad_ref, Cmid)
        midpad_ref[:, 1:H + 1, Cmid:(W + 1) * Cmid] = y1.reshape(N, H, W * Cmid)
        y2 = conv_bn_relu(midpad_ref, bw2_ref, g2_ref, b2_ref, gm2_ref)

        # Result is already lane-dense (W*Cout = 128 lanes at the example
        # shape): full-width unmasked stores, no concatenate needed.
        o_ref[...] = y2.reshape(N, H, W * Cout)

    flops = 2 * rows * 3 * ((W + 2) * Cin * W * Cmid + (W + 2) * Cmid * W * Cout)
    bytes_accessed = 4 * (x_ld.size + bw1.size + bw2.size + gm1.size + gm2.size
                          + 2 * (W * Cmid + W * Cout) + N * H * W * Cout)

    vmem = pl.BlockSpec(memory_space=pltpu.MemorySpace.VMEM)
    out = pl.pallas_call(
        kernel,
        out_shape=jax.ShapeDtypeStruct((N, H, W * Cout), f32),
        in_specs=[vmem] * 9,
        out_specs=vmem,
        scratch_shapes=[
            pltpu.VMEM((N, H + 2, (W + 2) * Cin), f32),    # lane-dense xpad
            pltpu.VMEM((N, H + 2, (W + 2) * Cmid), f32),   # lane-dense midpad
        ],
        compiler_params=pltpu.CompilerParams(
            vmem_limit_bytes=32 * 1024 * 1024),
        cost_estimate=pl.CostEstimate(
            flops=flops,
            transcendentals=W * (Cmid + Cout),
            bytes_accessed=bytes_accessed),
    )(x_ld, bw1, g1l, b1l, gm1, bw2, g2l, b2l, gm2)

    # Free reshape of the lane-dense slab back to NHWC.
    return out.reshape(N, H, W, Cout)


def init_params(key, in_dim, out_dim):
    """Deterministic PyTorch-like init for Conv2DBlock(in_dim, out_dim, (3,3))."""
    k1, k2 = jax.random.split(key)
    fan_in = in_dim * 3 * 3
    bound = 1.0 / jnp.sqrt(fan_in)
    w = jax.random.uniform(k1, (3, 3, in_dim, out_dim), jnp.float32,
                           minval=-bound, maxval=bound)   # (kH,kW,Cin,Cout)
    b = jax.random.uniform(k2, (out_dim,), jnp.float32,
                           minval=-bound, maxval=bound)
    gamma = jnp.ones((out_dim,), jnp.float32)   # BN weight init
    beta = jnp.zeros((out_dim,), jnp.float32)   # BN bias init
    return w, b, gamma, beta


@jax.jit
def double_2d_conv(x_nchw, params1, params2):
    # NCHW (PyTorch) -> NHWC (kernel layout)
    x = jnp.transpose(x_nchw, (0, 2, 3, 1)).astype(jnp.float32)
    y = double_conv_pallas(x, params1, params2)
    # back to NCHW to match the PyTorch module's output convention
    return jnp.transpose(y, (0, 3, 1, 2))


def _ref_block(x, w, b, gamma, beta):
    """Pure-JAX reference of Conv2DBlock (NHWC), training-mode BN."""
    y = jax.lax.conv_general_dilated(
        x, w, window_strides=(1, 1), padding='SAME',
        dimension_numbers=('NHWC', 'HWIO', 'NHWC'),
        precision=jax.lax.Precision.HIGHEST) + b
    mean = jnp.mean(y, axis=(0, 1, 2))
    var = jnp.mean((y - mean) ** 2, axis=(0, 1, 2))
    y = (y - mean) * jax.lax.rsqrt(var + _BN_EPS) * gamma + beta
    return jnp.maximum(y, 0.0)


if __name__ == "__main__":
    key = jax.random.PRNGKey(0)
    kx, kp1, kp2 = jax.random.split(key, 3)

    in_dim, out_dim = 4, 8
    N, H, W = 2, 16, 16

    x = jax.random.normal(kx, (N, in_dim, H, W), jnp.float32)  # NCHW input
    params1 = init_params(kp1, in_dim, out_dim)
    params2 = init_params(kp2, out_dim, out_dim)

    y = double_2d_conv(x, params1, params2)
    jax.block_until_ready(y)
    assert y.shape == (N, out_dim, H, W)

    # Correctness vs. a pure-JAX reference of the PyTorch forward.
    x_nhwc = jnp.transpose(x, (0, 2, 3, 1))
    ref = _ref_block(_ref_block(x_nhwc, *params1), *params2)
    ref = jnp.transpose(ref, (0, 3, 1, 2))
    err = float(jnp.max(jnp.abs(y - ref)))
    assert err < 1e-2, f"max abs error {err}"
    print("KERNEL_OK")
</pallas_src>

<mosaic_0001>
module attributes {stable_mosaic.version = 11 : i64} {
  func.func @kernel(%arg0: memref<2x16x64xf32, #tpu.memory_space<vmem>>, %arg1: memref<3x72x128xf32, #tpu.memory_space<vmem>>, %arg2: memref<1x128xf32, #tpu.memory_space<vmem>>, %arg3: memref<1x128xf32, #tpu.memory_space<vmem>>, %arg4: memref<128x128xf32, #tpu.memory_space<vmem>>, %arg5: memref<3x144x128xf32, #tpu.memory_space<vmem>>, %arg6: memref<1x128xf32, #tpu.memory_space<vmem>>, %arg7: memref<1x128xf32, #tpu.memory_space<vmem>>, %arg8: memref<128x128xf32, #tpu.memory_space<vmem>>, %arg9: memref<2x16x128xf32, #tpu.memory_space<vmem>>, %arg10: memref<2x18x72xf32, #tpu.memory_space<vmem>>, %arg11: memref<2x18x144xf32, #tpu.memory_space<vmem>>) attributes {dimension_semantics = [], scalar_prefetch = 0 : i64, scratch_operands = 2 : i64, tpu.core_type = #tpu.core_type<tc>} {
    %cst = arith.constant 0.000000e+00 : f32
    %0 = vector.broadcast %cst : f32 to vector<2x1x72xf32>
    %c0 = arith.constant 0 : index
    %c0_0 = arith.constant 0 : index
    %c0_1 = arith.constant 0 : index
    %1 = vector.load %arg10[%c0, %c0_0, %c0_1] : memref<2x18x72xf32, #tpu.memory_space<vmem>>, vector<2x1x72xf32>
    tpu.vector_store %arg10[%c0, %c0_0, %c0_1], %0 {strides = array<i32>} : memref<2x18x72xf32, #tpu.memory_space<vmem>>, vector<2x1x72xf32>,
    %cst_2 = arith.constant 0.000000e+00 : f32
    %2 = vector.broadcast %cst_2 : f32 to vector<2x1x72xf32>
    %c0_3 = arith.constant 0 : index
    %c17 = arith.constant 17 : index
    %c0_4 = arith.constant 0 : index
    %3 = vector.load %arg10[%c0_3, %c17, %c0_4] : memref<2x18x72xf32, #tpu.memory_space<vmem>>, vector<2x1x72xf32>
    tpu.vector_store %arg10[%c0_3, %c17, %c0_4], %2 {strides = array<i32>} : memref<2x18x72xf32, #tpu.memory_space<vmem>>, vector<2x1x72xf32>,
    %cst_5 = arith.constant 0.000000e+00 : f32
    %4 = vector.broadcast %cst_5 : f32 to vector<2x16x4xf32>
    %c0_6 = arith.constant 0 : index
    %c1 = arith.constant 1 : index
    %c0_7 = arith.constant 0 : index
    %5 = vector.load %arg10[%c0_6, %c1, %c0_7] : memref<2x18x72xf32, #tpu.memory_space<vmem>>, vector<2x16x4xf32>
    tpu.vector_store %arg10[%c0_6, %c1, %c0_7], %4 {strides = array<i32>} : memref<2x18x72xf32, #tpu.memory_space<vmem>>, vector<2x16x4xf32>,
    %cst_8 = arith.constant 0.000000e+00 : f32
    %6 = vector.broadcast %cst_8 : f32 to vector<2x16x4xf32>
    %c0_9 = arith.constant 0 : index
    %c1_10 = arith.constant 1 : index
    %c68 = arith.constant 68 : index
    %7 = vector.load %arg10[%c0_9, %c1_10, %c68] : memref<2x18x72xf32, #tpu.memory_space<vmem>>, vector<2x16x4xf32>
    tpu.vector_store %arg10[%c0_9, %c1_10, %c68], %6 {strides = array<i32>} : memref<2x18x72xf32, #tpu.memory_space<vmem>>, vector<2x16x4xf32>,
    %c0_11 = arith.constant 0 : index
    %c0_12 = arith.constant 0 : index
    %c0_13 = arith.constant 0 : index
    %8 = vector.load %arg0[%c0_11, %c0_12, %c0_13] : memref<2x16x64xf32, #tpu.memory_space<vmem>>, vector<2x16x64xf32>
    %c0_14 = arith.constant 0 : index
    %c1_15 = arith.constant 1 : index
    %c4 = arith.constant 4 : index
    %9 = vector.load %arg10[%c0_14, %c1_15, %c4] : memref<2x18x72xf32, #tpu.memory_space<vmem>>, vector<2x16x64xf32>
    tpu.vector_store %arg10[%c0_14, %c1_15, %c4], %8 {strides = array<i32>} : memref<2x18x72xf32, #tpu.memory_space<vmem>>, vector<2x16x64xf32>,
    %cst_16 = arith.constant 0.000000e+00 : f32
    %10 = vector.broadcast %cst_16 : f32 to vector<32x128xf32>
    %c0_17 = arith.constant 0 : index
    %c0_18 = arith.constant 0 : index
    %c0_19 = arith.constant 0 : index
    %11 = vector.load %arg10[%c0_17, %c0_18, %c0_19] : memref<2x18x72xf32, #tpu.memory_space<vmem>>, vector<2x16x72xf32>
    %12 = vector.shape_cast %11 : vector<2x16x72xf32> to vector<32x72xf32>
    %c0_20 = arith.constant 0 : index
    %c0_21 = arith.constant 0 : index
    %c0_22 = arith.constant 0 : index
    %13 = vector.load %arg1[%c0_20, %c0_21, %c0_22] : memref<3x72x128xf32, #tpu.memory_space<vmem>>, vector<1x72x128xf32>
    %14 = vector.shape_cast %13 : vector<1x72x128xf32> to vector<72x128xf32>
    %cst_23 = arith.constant dense<0.000000e+00> : vector<32x128xf32>
    %15 = tpu.matmul %12, %14, %cst_23 {dimension_numbers = #tpu.dot_dimension_numbers<[1], [0], [0], [1], [0, 0, 1, 1], [], []>} : vector<32x72xf32>, vector<72x128xf32>, vector<32x128xf32> -> vector<32x128xf32>
    %16 = arith.addf %10, %15 : vector<32x128xf32>
    %c0_24 = arith.constant 0 : index
    %c1_25 = arith.constant 1 : index
    %c0_26 = arith.constant 0 : index
    %17 = vector.load %arg10[%c0_24, %c1_25, %c0_26] : memref<2x18x72xf32, #tpu.memory_space<vmem>>, vector<2x16x72xf32>
    %18 = vector.shape_cast %17 : vector<2x16x72xf32> to vector<32x72xf32>
    %c1_27 = arith.constant 1 : index
    %c0_28 = arith.constant 0 : index
    %c0_29 = arith.constant 0 : index
    %19 = vector.load %arg1[%c1_27, %c0_28, %c0_29] : memref<3x72x128xf32, #tpu.memory_space<vmem>>, vector<1x72x128xf32>
    %20 = vector.shape_cast %19 : vector<1x72x128xf32> to vector<72x128xf32>
    %cst_30 = arith.constant dense<0.000000e+00> : vector<32x128xf32>
    %21 = tpu.matmul %18, %20, %cst_30 {dimension_numbers = #tpu.dot_dimension_numbers<[1], [0], [0], [1], [0, 0, 1, 1], [], []>} : vector<32x72xf32>, vector<72x128xf32>, vector<32x128xf32> -> vector<32x128xf32>
    %22 = arith.addf %16, %21 : vector<32x128xf32>
    %c0_31 = arith.constant 0 : index
    %c2 = arith.constant 2 : index
    %c0_32 = arith.constant 0 : index
    %23 = vector.load %arg10[%c0_31, %c2, %c0_32] : memref<2x18x72xf32, #tpu.memory_space<vmem>>, vector<2x16x72xf32>
    %24 = vector.shape_cast %23 : vector<2x16x72xf32> to vector<32x72xf32>
    %c2_33 = arith.constant 2 : index
    %c0_34 = arith.constant 0 : index
    %c0_35 = arith.constant 0 : index
    %25 = vector.load %arg1[%c2_33, %c0_34, %c0_35] : memref<3x72x128xf32, #tpu.memory_space<vmem>>, vector<1x72x128xf32>
    %26 = vector.shape_cast %25 : vector<1x72x128xf32> to vector<72x128xf32>
    %cst_36 = arith.constant dense<0.000000e+00> : vector<32x128xf32>
    %27 = tpu.matmul %24, %26, %cst_36 {dimension_numbers = #tpu.dot_dimension_numbers<[1], [0], [0], [1], [0, 0, 1, 1], [], []>} : vector<32x72xf32>, vector<72x128xf32>, vector<32x128xf32> -> vector<32x128xf32>
    %28 = arith.addf %22, %27 : vector<32x128xf32>
    %cst_37 = arith.constant dense<0.000000e+00> : vector<128xf32>
    %29 = vector.multi_reduction <add>, %28, %cst_37 [0] : vector<32x128xf32> to vector<128xf32>
    %30 = vector.shape_cast %29 : vector<128xf32> to vector<1x128xf32>
    %c0_38 = arith.constant 0 : index
    %c0_39 = arith.constant 0 : index
    %31 = vector.load %arg4[%c0_38, %c0_39] : memref<128x128xf32, #tpu.memory_space<vmem>>, vector<128x128xf32>
    %cst_40 = arith.constant dense<0.000000e+00> : vector<1x128xf32>
    %32 = tpu.matmul %30, %31, %cst_40 {dimension_numbers = #tpu.dot_dimension_numbers<[1], [0], [0], [1], [0, 0, 1, 1], [], []>} : vector<1x128xf32>, vector<128x128xf32>, vector<1x128xf32> -> vector<1x128xf32>
    %cst_41 = arith.constant 0.001953125 : f32
    %33 = vector.broadcast %cst_41 : f32 to vector<1x128xf32>
    %34 = arith.mulf %32, %33 : vector<1x128xf32>
    %35 = vector.broadcast %34 : vector<1x128xf32> to vector<32x128xf32>
    %36 = arith.subf %28, %35 : vector<32x128xf32>
    %37 = arith.mulf %36, %36 : vector<32x128xf32>
    %cst_42 = arith.constant dense<0.000000e+00> : vector<128xf32>
    %38 = vector.multi_reduction <add>, %37, %cst_42 [0] : vector<32x128xf32> to vector<128xf32>
    %39 = vector.shape_cast %38 : vector<128xf32> to vector<1x128xf32>
    %c0_43 = arith.constant 0 : index
    %c0_44 = arith.constant 0 : index
    %40 = vector.load %arg4[%c0_43, %c0_44] : memref<128x128xf32, #tpu.memory_space<vmem>>, vector<128x128xf32>
    %cst_45 = arith.constant dense<0.000000e+00> : vector<1x128xf32>
    %41 = tpu.matmul %39, %40, %cst_45 {dimension_numbers = #tpu.dot_dimension_numbers<[1], [0], [0], [1], [0, 0, 1, 1], [], []>} : vector<1x128xf32>, vector<128x128xf32>, vector<1x128xf32> -> vector<1x128xf32>
    %cst_46 = arith.constant 0.001953125 : f32
    %42 = vector.broadcast %cst_46 : f32 to vector<1x128xf32>
    %43 = arith.mulf %41, %42 : vector<1x128xf32>
    %c0_47 = arith.constant 0 : index
    %c0_48 = arith.constant 0 : index
    %44 = vector.load %arg2[%c0_47, %c0_48] : memref<1x128xf32, #tpu.memory_space<vmem>>, vector<1x128xf32>
    %cst_49 = arith.constant 9.99999974E-6 : f32
    %45 = vector.broadcast %cst_49 : f32 to vector<1x128xf32>
    %46 = arith.addf %43, %45 : vector<1x128xf32>
    %47 = math.rsqrt %46 : vector<1x128xf32>
    %48 = arith.mulf %44, %47 : vector<1x128xf32>
    %49 = vector.broadcast %48 : vector<1x128xf32> to vector<32x128xf32>
    %50 = arith.mulf %36, %49 : vector<32x128xf32>
    %c0_50 = arith.constant 0 : index
    %c0_51 = arith.constant 0 : index
    %51 = vector.load %arg3[%c0_50, %c0_51] : memref<1x128xf32, #tpu.memory_space<vmem>>, vector<1x128xf32>
    %52 = vector.broadcast %51 : vector<1x128xf32> to vector<32x128xf32>
    %53 = arith.addf %50, %52 : vector<32x128xf32>
    %cst_52 = arith.constant 0.000000e+00 : f32
    %54 = vector.broadcast %cst_52 : f32 to vector<32x128xf32>
    %55 = arith.maximumf %53, %54 : vector<32x128xf32>
    %cst_53 = arith.constant 0.000000e+00 : f32
    %56 = vector.broadcast %cst_53 : f32 to vector<2x1x144xf32>
    %c0_54 = arith.constant 0 : index
    %c0_55 = arith.constant 0 : index
    %c0_56 = arith.constant 0 : index
    %57 = vector.load %arg11[%c0_54, %c0_55, %c0_56] : memref<2x18x144xf32, #tpu.memory_space<vmem>>, vector<2x1x144xf32>
    tpu.vector_store %arg11[%c0_54, %c0_55, %c0_56], %56 {strides = array<i32>} : memref<2x18x144xf32, #tpu.memory_space<vmem>>, vector<2x1x144xf32>,
    %cst_57 = arith.constant 0.000000e+00 : f32
    %58 = vector.broadcast %cst_57 : f32 to vector<2x1x144xf32>
    %c0_58 = arith.constant 0 : index
    %c17_59 = arith.constant 17 : index
    %c0_60 = arith.constant 0 : index
    %59 = vector.load %arg11[%c0_58, %c17_59, %c0_60] : memref<2x18x144xf32, #tpu.memory_space<vmem>>, vector<2x1x144xf32>
    tpu.vector_store %arg11[%c0_58, %c17_59, %c0_60], %58 {strides = array<i32>} : memref<2x18x144xf32, #tpu.memory_space<vmem>>, vector<2x1x144xf32>,
    %cst_61 = arith.constant 0.000000e+00 : f32
    %60 = vector.broadcast %cst_61 : f32 to vector<2x16x8xf32>
    %c0_62 = arith.constant 0 : index
    %c1_63 = arith.constant 1 : index
    %c0_64 = arith.constant 0 : index
    %61 = vector.load %arg11[%c0_62, %c1_63, %c0_64] : memref<2x18x144xf32, #tpu.memory_space<vmem>>, vector<2x16x8xf32>
    tpu.vector_store %arg11[%c0_62, %c1_63, %c0_64], %60 {strides = array<i32>} : memref<2x18x144xf32, #tpu.memory_space<vmem>>, vector<2x16x8xf32>,
    %cst_65 = arith.constant 0.000000e+00 : f32
    %62 = vector.broadcast %cst_65 : f32 to vector<2x16x8xf32>
    %c0_66 = arith.constant 0 : index
    %c1_67 = arith.constant 1 : index
    %c136 = arith.constant 136 : index
    %63 = vector.load %arg11[%c0_66, %c1_67, %c136] : memref<2x18x144xf32, #tpu.memory_space<vmem>>, vector<2x16x8xf32>
    tpu.vector_store %arg11[%c0_66, %c1_67, %c136], %62 {strides = array<i32>} : memref<2x18x144xf32, #tpu.memory_space<vmem>>, vector<2x16x8xf32>,
    %64 = vector.shape_cast %55 : vector<32x128xf32> to vector<2x16x128xf32>
    %c0_68 = arith.constant 0 : index
    %c1_69 = arith.constant 1 : index
    %c8 = arith.constant 8 : index
    %65 = vector.load %arg11[%c0_68, %c1_69, %c8] : memref<2x18x144xf32, #tpu.memory_space<vmem>>, vector<2x16x128xf32>
    tpu.vector_store %arg11[%c0_68, %c1_69, %c8], %64 {strides = array<i32>} : memref<2x18x144xf32, #tpu.memory_space<vmem>>, vector<2x16x128xf32>,
    %cst_70 = arith.constant 0.000000e+00 : f32
    %66 = vector.broadcast %cst_70 : f32 to vector<32x128xf32>
    %c0_71 = arith.constant 0 : index
    %c0_72 = arith.constant 0 : index
    %c0_73 = arith.constant 0 : index
    %67 = vector.load %arg11[%c0_71, %c0_72, %c0_73] : memref<2x18x144xf32, #tpu.memory_space<vmem>>, vector<2x16x144xf32>
    %68 = vector.shape_cast %67 : vector<2x16x144xf32> to vector<32x144xf32>
    %c0_74 = arith.constant 0 : index
    %c0_75 = arith.constant 0 : index
    %c0_76 = arith.constant 0 : index
    %69 = vector.load %arg5[%c0_74, %c0_75, %c0_76] : memref<3x144x128xf32, #tpu.memory_space<vmem>>, vector<1x144x128xf32>
    %70 = vector.shape_cast %69 : vector<1x144x128xf32> to vector<144x128xf32>
    %cst_77 = arith.constant dense<0.000000e+00> : vector<32x128xf32>
    %71 = tpu.matmul %68, %70, %cst_77 {dimension_numbers = #tpu.dot_dimension_numbers<[1], [0], [0], [1], [0, 0, 1, 1], [], []>} : vector<32x144xf32>, vector<144x128xf32>, vector<32x128xf32> -> vector<32x128xf32>
    %72 = arith.addf %66, %71 : vector<32x128xf32>
    %c0_78 = arith.constant 0 : index
    %c1_79 = arith.constant 1 : index
    %c0_80 = arith.constant 0 : index
    %73 = vector.load %arg11[%c0_78, %c1_79, %c0_80] : memref<2x18x144xf32, #tpu.memory_space<vmem>>, vector<2x16x144xf32>
    %74 = vector.shape_cast %73 : vector<2x16x144xf32> to vector<32x144xf32>
    %c1_81 = arith.constant 1 : index
    %c0_82 = arith.constant 0 : index
    %c0_83 = arith.constant 0 : index
    %75 = vector.load %arg5[%c1_81, %c0_82, %c0_83] : memref<3x144x128xf32, #tpu.memory_space<vmem>>, vector<1x144x128xf32>
    %76 = vector.shape_cast %75 : vector<1x144x128xf32> to vector<144x128xf32>
    %cst_84 = arith.constant dense<0.000000e+00> : vector<32x128xf32>
    %77 = tpu.matmul %74, %76, %cst_84 {dimension_numbers = #tpu.dot_dimension_numbers<[1], [0], [0], [1], [0, 0, 1, 1], [], []>} : vector<32x144xf32>, vector<144x128xf32>, vector<32x128xf32> -> vector<32x128xf32>
    %78 = arith.addf %72, %77 : vector<32x128xf32>
    %c0_85 = arith.constant 0 : index
    %c2_86 = arith.constant 2 : index
    %c0_87 = arith.constant 0 : index
    %79 = vector.load %arg11[%c0_85, %c2_86, %c0_87] : memref<2x18x144xf32, #tpu.memory_space<vmem>>, vector<2x16x144xf32>
    %80 = vector.shape_cast %79 : vector<2x16x144xf32> to vector<32x144xf32>
    %c2_88 = arith.constant 2 : index
    %c0_89 = arith.constant 0 : index
    %c0_90 = arith.constant 0 : index
    %81 = vector.load %arg5[%c2_88, %c0_89, %c0_90] : memref<3x144x128xf32, #tpu.memory_space<vmem>>, vector<1x144x128xf32>
    %82 = vector.shape_cast %81 : vector<1x144x128xf32> to vector<144x128xf32>
    %cst_91 = arith.constant dense<0.000000e+00> : vector<32x128xf32>
    %83 = tpu.matmul %80, %82, %cst_91 {dimension_numbers = #tpu.dot_dimension_numbers<[1], [0], [0], [1], [0, 0, 1, 1], [], []>} : vector<32x144xf32>, vector<144x128xf32>, vector<32x128xf32> -> vector<32x128xf32>
    %84 = arith.addf %78, %83 : vector<32x128xf32>
    %cst_92 = arith.constant dense<0.000000e+00> : vector<128xf32>
    %85 = vector.multi_reduction <add>, %84, %cst_92 [0] : vector<32x128xf32> to vector<128xf32>
    %86 = vector.shape_cast %85 : vector<128xf32> to vector<1x128xf32>
    %c0_93 = arith.constant 0 : index
    %c0_94 = arith.constant 0 : index
    %87 = vector.load %arg8[%c0_93, %c0_94] : memref<128x128xf32, #tpu.memory_space<vmem>>, vector<128x128xf32>
    %cst_95 = arith.constant dense<0.000000e+00> : vector<1x128xf32>
    %88 = tpu.matmul %86, %87, %cst_95 {dimension_numbers = #tpu.dot_dimension_numbers<[1], [0], [0], [1], [0, 0, 1, 1], [], []>} : vector<1x128xf32>, vector<128x128xf32>, vector<1x128xf32> -> vector<1x128xf32>
    %cst_96 = arith.constant 0.001953125 : f32
    %89 = vector.broadcast %cst_96 : f32 to vector<1x128xf32>
    %90 = arith.mulf %88, %89 : vector<1x128xf32>
    %91 = vector.broadcast %90 : vector<1x128xf32> to vector<32x128xf32>
    %92 = arith.subf %84, %91 : vector<32x128xf32>
    %93 = arith.mulf %92, %92 : vector<32x128xf32>
    %cst_97 = arith.constant dense<0.000000e+00> : vector<128xf32>
    %94 = vector.multi_reduction <add>, %93, %cst_97 [0] : vector<32x128xf32> to vector<128xf32>
    %95 = vector.shape_cast %94 : vector<128xf32> to vector<1x128xf32>
    %c0_98 = arith.constant 0 : index
    %c0_99 = arith.constant 0 : index
    %96 = vector.load %arg8[%c0_98, %c0_99] : memref<128x128xf32, #tpu.memory_space<vmem>>, vector<128x128xf32>
    %cst_100 = arith.constant dense<0.000000e+00> : vector<1x128xf32>
    %97 = tpu.matmul %95, %96, %cst_100 {dimension_numbers = #tpu.dot_dimension_numbers<[1], [0], [0], [1], [0, 0, 1, 1], [], []>} : vector<1x128xf32>, vector<128x128xf32>, vector<1x128xf32> -> vector<1x128xf32>
    %cst_101 = arith.constant 0.001953125 : f32
    %98 = vector.broadcast %cst_101 : f32 to vector<1x128xf32>
    %99 = arith.mulf %97, %98 : vector<1x128xf32>
    %c0_102 = arith.constant 0 : index
    %c0_103 = arith.constant 0 : index
    %100 = vector.load %arg6[%c0_102, %c0_103] : memref<1x128xf32, #tpu.memory_space<vmem>>, vector<1x128xf32>
    %cst_104 = arith.constant 9.99999974E-6 : f32
    %101 = vector.broadcast %cst_104 : f32 to vector<1x128xf32>
    %102 = arith.addf %99, %101 : vector<1x128xf32>
    %103 = math.rsqrt %102 : vector<1x128xf32>
    %104 = arith.mulf %100, %103 : vector<1x128xf32>
    %105 = vector.broadcast %104 : vector<1x128xf32> to vector<32x128xf32>
    %106 = arith.mulf %92, %105 : vector<32x128xf32>
    %c0_105 = arith.constant 0 : index
    %c0_106 = arith.constant 0 : index
    %107 = vector.load %arg7[%c0_105, %c0_106] : memref<1x128xf32, #tpu.memory_space<vmem>>, vector<1x128xf32>
    %108 = vector.broadcast %107 : vector<1x128xf32> to vector<32x128xf32>
    %109 = arith.addf %106, %108 : vector<32x128xf32>
    %cst_107 = arith.constant 0.000000e+00 : f32
    %110 = vector.broadcast %cst_107 : f32 to vector<32x128xf32>
    %111 = arith.maximumf %109, %110 : vector<32x128xf32>
    %112 = vector.shape_cast %111 : vector<32x128xf32> to vector<2x16x128xf32>
    %c0_108 = arith.constant 0 : index
    %c0_109 = arith.constant 0 : index
    %c0_110 = arith.constant 0 : index
    %113 = vector.load %arg9[%c0_108, %c0_109, %c0_110] : memref<2x16x128xf32, #tpu.memory_space<vmem>>, vector<2x16x128xf32>
    tpu.vector_store %arg9[%c0_108, %c0_109, %c0_110], %112 {strides = array<i32>} : memref<2x16x128xf32, #tpu.memory_space<vmem>>, vector<2x16x128xf32>,
    return
  }
}

</mosaic_0001>

<bundles_post_ra>
// kernel: tile.23
= control target key start
LH: loop header
LB: loop body
LE: loop exit
PB: predicated region body
PF: predicated region fallthrough
CT: control target
= control target key end

     0   :  { %s28_s0 = inlined_call_operand.vmem [shape: f32[8], index: 0, kind: input, shape index: {}]   ;;  %s29_s1 = inlined_call_operand.vmem [shape: f32[16,8], index: 1, kind: output, shape index: {}]  }
   0x1   :  { %v4_v0 = vld [vmem:[%s28_s0] ss:$0 sm:$0xff] }
   0x2   :  { %5 = vst [vmem:[%s29_s1] sm:$0xff] %v4_v0  ;;  %8 = vst [vmem:[%s29_s1 + $0x8] sm:$0xff] %v4_v0 }

// kernel: tile.24
= control target key start
LH: loop header
LB: loop body
LE: loop exit
PB: predicated region body
PF: predicated region fallthrough
CT: control target
= control target key end

     0   :  { %s131_s10 = smov 120   ;;  %s132_s11 = smov 104   ;;  %vm3_vm0 = vcmask 64512   ;;  %vm9_vm1 = vcmask 1048512   ;;  %vm15_vm2 = vcmask 982912   ;;  %vm21_vm3 = vcmask 917312   ;;  %s207_s0 = inlined_call_operand.vmem [shape: f32[16,8], index: 0, kind: input, shape index: {}]   ;;  %s208_s1 = inlined_call_operand.vmem [shape: f32[1,128], index: 1, kind: output, shape index: {}]  }
   0x1   :  { %v101_v0 = vld [vmem:[%s207_s0 + $0xf] sm:$0x1]   ;;  %v103_v1 = vld [vmem:[%s207_s0 + $0xd] sm:$0x1]   ;;  %v102_v2 = vld [vmem:[%s207_s0 + $0xe] sm:$0x1]  }
   0x2   :  { %7 = vrot.lane.b32.xlu0 %v101_v0, %s131_s10  ;;  %19 = vrot.lane.b32.xlu1 %v103_v1, %s132_s11  ;;  %v104_v3 = vld [vmem:[%s207_s0 + $0xc] sm:$0x1]   ;;  %s133_s16 = smov 112   ;;  %s134_s17 = smov 96   ;;  %v105_v4 = vld [vmem:[%s207_s0 + $0xb] sm:$0x1]  }
   0x3   :  { %v106_v5 = vld [vmem:[%s207_s0 + $0xa] sm:$0x1]   ;;  %v2_v6 = vld [vmem:[%s207_s0] sm:$0x1]   ;;  %s135_s24 = smov 88   ;;  %s136_s25 = smov 80  }
   0x4   :  { %4 = vst.msk [vmem:[#allocation0] sm:$0x1] %vm3_vm0, %v2_v6   ;;  %v107_v7 = vld [vmem:[%s207_s0 + $0x9] sm:$0x1]   ;;  %v108_v8 = vld [vmem:[%s207_s0 + $0x8] sm:$0x1]  }
   0x5   :  { %s137_s30 = smov 72   ;;  %s138_s2 = smov 64   ;;  %v109_v9 = vld [vmem:[%s207_s0 + $0x7] sm:$0x1]   ;;  %v110_v10 = vld [vmem:[%s207_s0 + $0x6] sm:$0x1]  }
   0x6   :  { %13 = vrot.lane.b32.xlu0 %v102_v2, %s133_s16  ;;  %25 = vrot.lane.b32.xlu1 %v104_v3, %s134_s17  ;;  %s139_s7 = smov 56   ;;  %s140_s8 = smov 48   ;;  %v111_v11 = vld [vmem:[%s207_s0 + $0x5] sm:$0x1]   ;;  %v112_v12 = vld [vmem:[%s207_s0 + $0x4] sm:$0x1]  }
   0x7   :  { %s141_s13 = smov 40   ;;  %s142_s14 = smov 32   ;;  %v113_v13 = vld [vmem:[%s207_s0 + $0x3] sm:$0x1]   ;;  %v114_v14 = vld [vmem:[%s207_s0 + $0x2] sm:$0x1]  }
   0x8   :  { %s143_s19 = smov 24   ;;  %s144_s20 = smov 16   ;;  %v115_v15 = vld [vmem:[%s207_s0 + $0x1] sm:$0x1]   ;;  %vm27_vm4 = vcmask 851712   ;;  %vm33_vm5 = vcmask 786112  }
   0x9   :  { %s145_s0 = smov 8   ;;  %vm39_vm6 = vcmask 720512   ;;  %vm45_vm7 = vcmask 654912   ;;  %vm51_vm8 = vcmask 589312   ;;  %vm57_vm9 = vcmask 523712  }
   0xa   :  { %31 = vrot.lane.b32.xlu0 %v105_v4, %s135_s24  ;;  %37 = vrot.lane.b32.xlu1 %v106_v5, %s136_s25  ;;  %vm63_vm10 = vcmask 458112   ;;  %vm69_vm11 = vcmask 392512   ;;  %vm75_vm12 = vcmask 326912   ;;  %vm81_vm13 = vcmask 261312  }
   0xb   :  { %vm87_vm14 = vcmask 195712   ;;  %vm93_vm15 = vcmask 130112  }
   0xe   :  { %43 = vrot.lane.b32.xlu0 %v107_v7, %s137_s30  ;;  %49 = vrot.lane.b32.xlu1 %v108_v8, %s138_s2 }
  0x12   :  { %55 = vrot.lane.b32.xlu0 %v109_v9, %s139_s7  ;;  %61 = vrot.lane.b32.xlu1 %v110_v10, %s140_s8 }
  0x16   :  { %67 = vrot.lane.b32.xlu0 %v111_v11, %s141_s13  ;;  %73 = vrot.lane.b32.xlu1 %v112_v12, %s142_s14 }
  0x1a   :  { %79 = vrot.lane.b32.xlu0 %v113_v13, %s143_s19  ;;  %85 = vrot.lane.b32.xlu1 %v114_v14, %s144_s20 }
  0x1e   :  { %91 = vrot.lane.b32.xlu0 %v115_v15, %s145_s0 }
  0x74   :  { %v8_v16 = vpop.permute.xlu0 %7   ;;  %v20_v17 = vpop.permute.xlu1 %19  }
  0x75   :  { %10 = vst.msk [vmem:[#allocation0] sm:$0x1] %vm9_vm1, %v8_v16  }
  0x78   :  { %v14_v18 = vpop.permute.xlu0 %13   ;;  %v26_v19 = vpop.permute.xlu1 %25  }
  0x79   :  { %16 = vst.msk [vmem:[#allocation0] sm:$0x1] %vm15_vm2, %v14_v18  }
  0x7a   :  { %22 = vst.msk [vmem:[#allocation0] sm:$0x1] %vm21_vm3, %v20_v17  }
  0x7b   :  { %28 = vst.msk [vmem:[#allocation0] sm:$0x1] %vm27_vm4, %v26_v19  }
  0x7c   :  { %v32_v20 = vpop.permute.xlu0 %31   ;;  %v38_v21 = vpop.permute.xlu1 %37  }
  0x7d   :  { %34 = vst.msk [vmem:[#allocation0] sm:$0x1] %vm33_vm5, %v32_v20  }
  0x7e   :  { %40 = vst.msk [vmem:[#allocation0] sm:$0x1] %vm39_vm6, %v38_v21  }
  0x80   :  { %v44_v22 = vpop.permute.xlu0 %43   ;;  %v50_v23 = vpop.permute.xlu1 %49  }
  0x81   :  { %46 = vst.msk [vmem:[#allocation0] sm:$0x1] %vm45_vm7, %v44_v22  }
  0x82   :  { %52 = vst.msk [vmem:[#allocation0] sm:$0x1] %vm51_vm8, %v50_v23  }
  0x84   :  { %v56_v24 = vpop.permute.xlu0 %55   ;;  %v62_v25 = vpop.permute.xlu1 %61  }
  0x85   :  { %58 = vst.msk [vmem:[#allocation0] sm:$0x1] %vm57_vm9, %v56_v24  }
  0x86   :  { %64 = vst.msk [vmem:[#allocation0] sm:$0x1] %vm63_vm10, %v62_v25  }
  0x88   :  { %v68_v26 = vpop.permute.xlu0 %67   ;;  %v74_v27 = vpop.permute.xlu1 %73  }
  0x89   :  { %70 = vst.msk [vmem:[#allocation0] sm:$0x1] %vm69_vm11, %v68_v26  }
  0x8a   :  { %76 = vst.msk [vmem:[#allocation0] sm:$0x1] %vm75_vm12, %v74_v27  }
  0x8c   :  { %v80_v28 = vpop.permute.xlu0 %79   ;;  %v86_v29 = vpop.permute.xlu1 %85  }
  0x8d   :  { %82 = vst.msk [vmem:[#allocation0] sm:$0x1] %vm81_vm13, %v80_v28  }
  0x8e   :  { %88 = vst.msk [vmem:[#allocation0] sm:$0x1] %vm87_vm14, %v86_v29  }
  0x90   :  { %v92_v30 = vpop.permute.xlu0 %91  }
  0x91   :  { %94 = vst.msk [vmem:[#allocation0] sm:$0x1] %vm93_vm15, %v92_v30  }
  0x98   :  { %v98_v31 = vld [vmem:[#allocation0] sm:$0x1] }
  0x99   :  { %100 = vst [vmem:[%s208_s1] sm:$0x1] %v98_v31 }

// kernel: double_2d_conv.1
= control target key start
LH: loop header
LB: loop body
LE: loop exit
PB: predicated region body
PF: predicated region fallthrough
CT: control target
= control target key end

     0   :  { %vm37_vm0 = vcmask 31744   ;;  %vm42_vm1 = vcmask 589344   ;;  %v2021_v3 = vmov 0.0   ;;  %vm32_vm2 = vcmask 581632   ;;  %s2022_s15 = smov 4   ;;  %s2656_s0 = inlined_call_operand.vmem [shape: f32[2,16,64], index: 0, kind: input, shape index: {}]   ;;  %s2657_s1 = inlined_call_operand.vmem [shape: f32[3,72,128], index: 1, kind: input, shape index: {}]   ;;  %s2658_s4 = inlined_call_operand.vmem [shape: f32[128,128], index: 4, kind: input, shape index: {}, may-alias: {4,8}]   ;;  %s2659_s5 = inlined_call_operand.vmem [shape: f32[3,144,128], index: 5, kind: input, shape index: {}]   ;;  %s2660_s2 = inlined_call_operand.vmem [shape: f32[1,128], index: 2, kind: input, shape index: {}]   ;;  %s2661_s3 = inlined_call_operand.vmem [shape: f32[1,128], index: 3, kind: input, shape index: {}]   ;;  %s2662_s8 = inlined_call_operand.vmem [shape: f32[128,128], index: 8, kind: input, shape index: {}, may-alias: {4,8}]   ;;  %s2663_s6 = inlined_call_operand.vmem [shape: f32[1,128], index: 6, kind: input, shape index: {}]   ;;  %s2664_s7 = inlined_call_operand.vmem [shape: f32[1,128], index: 7, kind: input, shape index: {}]   ;;  %s2665_s9 = inlined_call_operand.vmem [shape: f32[2,16,128], index: 9, kind: output, shape index: {}]  }
   0x1   :  { %v47_v0 = vld [vmem:[%s2656_s0] sm:$0xff]  ;;  %v49_v1 = vld [vmem:[%s2656_s0 + $0x10] sm:$0xff]  ;;  %v48_v2 = vld [vmem:[%s2656_s0 + $0x8] sm:$0xff]  ;;  %38 = vst.msk [vmem:[#allocation2 + $0x1] sm:$0xff] %vm37_vm0, %v2021_v3  ;;  %vm67_vm3 = vcmask 556064   ;;  %vm99_vm4 = vcmask 588800  }
   0x2   :  { %39 = vst.msk [vmem:[#allocation2 + $0x9] sm:$0xff] %vm37_vm0, %v2021_v3  ;;  %40 = vst.msk [vmem:[#allocation2 + $0x19] sm:$0xff] %vm37_vm0, %v2021_v3  ;;  %55 = vrot.lane.b32.xlu0 %v47_v0, %s2022_s15  ;;  %59 = vrot.lane.b32.xlu1 %v49_v1, %s2022_s15  ;;  %v50_v4 = vld [vmem:[%s2656_s0 + $0x18] sm:$0xff]  ;;  %v76_v5 = vld [vmem:[%s2657_s1] sm:$0xff]  ;;  %v2023_v60 = vmov 0.0|0.0   ;;  %vm2024_vm5 = vmmov 0  }
   0x3   :  { %41 = vst.msk [vmem:[#allocation2 + $0x21] sm:$0xff] %vm37_vm0, %v2021_v3  ;;  %v77_v6 = vld [vmem:[%s2657_s1 + $0x8] sm:$0xff]  ;;  %v1365_v8 = vld [vmem:[%s2657_s1 + $0x50] sm:$0xff]  ;;  %v79_v12 = vld [vmem:[%s2657_s1 + $0x18] sm:$0xff]  ;;  %vm641_vm7 = vcmask 64513   ;;  %vm650_vm8 = vcmask 130113  }
   0x4   :  { %43 = vst.msk [vmem:[#allocation2 + $0x1] sm:$0xff] %vm42_vm1, %v2021_v3  ;;  %44 = vst.msk [vmem:[#allocation2 + $0x9] sm:$0xff] %vm42_vm1, %v2021_v3  ;;  %v1364_v7 = vld [vmem:[%s2657_s1 + $0x48] sm:$0xff]  ;;  %v1779_v9 = vpack.c.bf16 %v77_v6, %v76_v5  ;;  %v78_v11 = vld [vmem:[%s2657_s1 + $0x10] sm:$0xff]  ;;  %vm643_vm9 = vcmask 64512   ;;  %vm652_vm10 = vcmask 130112  }
   0x5   :  { %45 = vst.msk [vmem:[#allocation2 + $0x19] sm:$0xff] %vm42_vm1, %v2021_v3  ;;  %46 = vst.msk [vmem:[#allocation2 + $0x21] sm:$0xff] %vm42_vm1, %v2021_v3  ;;  %v1763_v10 = vpack.c.bf16 %v1365_v8, %v1364_v7  ;;  %v1366_v13 = vld [vmem:[%s2657_s1 + $0x58] sm:$0xff]  ;;  %v1783_v14 = vpack.c.bf16 %v79_v12, %v78_v11  ;;  %v1367_v15 = vld [vmem:[%s2657_s1 + $0x60] sm:$0xff]  ;;  %vm645_vm11 = vcmask 57344   ;;  %vm654_vm12 = vcmask 122944  }
   0x6   :  { %33 = vst.msk [vmem:[#allocation2] sm:$0x1] %vm32_vm2, %v2021_v3  ;;  %34 = vst.msk [vmem:[#allocation2 + $0x18] sm:$0x1] %vm32_vm2, %v2021_v3  ;;  %v80_v16 = vld [vmem:[%s2657_s1 + $0x20] sm:$0xff]  ;;  %v81_v17 = vld [vmem:[%s2657_s1 + $0x28] sm:$0xff]  ;;  %57 = vrot.lane.b32.xlu0 %v48_v2, %s2022_s15  ;;  %61 = vrot.lane.b32.xlu1 %v50_v4, %s2022_s15  ;;  %v1767_v18 = vpack.c.bf16 %v1367_v15, %v1366_v13 }
   0x7   :  { %35 = vst.msk [vmem:[#allocation2 + $0x11] sm:$0x1] %vm32_vm2, %v2021_v3  ;;  %36 = vst.msk [vmem:[#allocation2 + $0x29] sm:$0x1] %vm32_vm2, %v2021_v3  ;;  %v1368_v19 = vld [vmem:[%s2657_s1 + $0x68] sm:$0xff]  ;;  %v1369_v20 = vld [vmem:[%s2657_s1 + $0x70] sm:$0xff]  ;;  %1780 = vmatprep.subr.bf16.mxu0 %v1779_v9  ;;  %1764 = vmatprep.subr.bf16.mxu1 %v1763_v10  ;;  %v1787_v21 = vpack.c.bf16 %v81_v17, %v80_v16 }
   0x8   :  { %1782 = vmatpush3.bf16.msra.mxu0 %v1779_v9  ;;  %1766 = vmatpush3.bf16.msra.mxu1 %v1763_v10  ;;  %v1771_v22 = vpack.c.bf16 %v1369_v20, %v1368_v19  ;;  %v82_v23 = vld [vmem:[%s2657_s1 + $0x30] sm:$0xff]  ;;  %v83_v24 = vld [vmem:[%s2657_s1 + $0x38] sm:$0xff]  ;;  %v1371_v26 = vld [vmem:[%s2657_s1 + $0x80] sm:$0xff]  ;;  %642 = vst.msk [vmem:[#allocation3] sm:$0xfe] %vm641_vm7, %v2021_v3  ;;  %vm663_vm13 = vcmask 1040384  }
   0x9   :  { %1784 = vmatprep.subr.bf16.mxu0 %v1783_v14  ;;  %1768 = vmatprep.subr.bf16.mxu1 %v1767_v18  ;;  %v1370_v25 = vld [vmem:[%s2657_s1 + $0x78] sm:$0xff]  ;;  %v1791_v27 = vpack.c.bf16 %v83_v24, %v82_v23  ;;  %v84_v29 = vld [vmem:[%s2657_s1 + $0x40] sm:$0xff]  ;;  %v1372_v30 = vld [vmem:[%s2657_s1 + $0x88] sm:$0xff]  ;;  %651 = vst.msk [vmem:[#allocation3 + $0x8] sm:$0xfe] %vm650_vm8, %v2021_v3  ;;  %vm688_vm14 = vcmask 1047617  }
   0xa   :  { %v1775_v28 = vpack.c.bf16 %v1371_v26, %v1370_v25  ;;  %v1381_v31 = vld [vmem:[%s2657_s1 + $0x90] sm:$0xff]  ;;  %v1382_v32 = vld [vmem:[%s2657_s1 + $0x98] sm:$0xff]  ;;  %v1383_v38 = vld [vmem:[%s2657_s1 + $0xa0] sm:$0xff]  ;;  %647 = vst.msk [vmem:[#allocation3 + $0x30] sm:$0xfe] %vm641_vm7, %v2021_v3  ;;  %vm691_vm15 = vcmask 1047616  }
   0xb   :  { %v1795_v33 = vpack.c.bf16 %v1382_v32, %v1381_v31  ;;  %v1384_v41 = vld [vmem:[%s2657_s1 + $0xa8] sm:$0xff]  ;;  %v1385_v44 = vld [vmem:[%s2657_s1 + $0xb0] sm:$0xff]  ;;  %v1386_v45 = vld [vmem:[%s2657_s1 + $0xb8] sm:$0xff]  ;;  %656 = vst.msk [vmem:[#allocation3 + $0x38] sm:$0xfe] %vm650_vm8, %v2021_v3  ;;  %vm694_vm0 = vcmask 1040448  }
   0xc   :  { %1786 = vmatpush3.bf16.msra.mxu0 %v1783_v14  ;;  %1770 = vmatpush3.bf16.msra.mxu1 %v1767_v18  ;;  %v1799_v43 = vpack.c.bf16 %v1384_v41, %v1383_v38  ;;  %v1803_v51 = vpack.c.bf16 %v1386_v45, %v1385_v44  ;;  %v1387_v52 = vld [vmem:[%s2657_s1 + $0xc0] sm:$0xff]  ;;  %v1388_v53 = vld [vmem:[%s2657_s1 + $0xc8] sm:$0xff]  ;;  %v1389_v56 = vld [vmem:[%s2657_s1 + $0xd0] sm:$0xff]  ;;  %644 = vst.msk [vmem:[#allocation3 + $0x10] sm:$0xff] %vm643_vm9, %v2021_v3  ;;  %vm749_vm1 = vcmask 1046528   ;;  %vm793_vm2 = vcmask 130048  }
   0xd   :  { %1788 = vmatprep.subr.bf16.mxu0 %v1787_v21  ;;  %1772 = vmatprep.subr.bf16.mxu1 %v1771_v22  ;;  %v1807_v55 = vpack.c.bf16 %v1388_v53, %v1387_v52  ;;  %v418_v61 = vld [vmem:[%s2658_s4] sm:$0xff]  ;;  %v419_v62 = vld [vmem:[%s2658_s4 + $0x8] sm:$0xff]  ;;  %v420_v0 = vld [vmem:[%s2658_s4 + $0x10] sm:$0xff]  ;;  %653 = vst.msk [vmem:[#allocation3 + $0x18] sm:$0xff] %vm652_vm10, %v2021_v3 }
   0xe   :  { %v1812_v63 = vpack.c.bf16 %v419_v62, %v418_v61  ;;  %v421_v1 = vld [vmem:[%s2658_s4 + $0x18] sm:$0xff]  ;;  %v422_v4 = vld [vmem:[%s2658_s4 + $0x20] sm:$0xff]  ;;  %v423_v5 = vld [vmem:[%s2658_s4 + $0x28] sm:$0xff]  ;;  %648 = vst.msk [vmem:[#allocation3 + $0x40] sm:$0xff] %vm643_vm9, %v2021_v3 }
   0xf   :  { %v1815_v2 = vpack.c.bf16 %v421_v1, %v420_v0  ;;  %v1818_v6 = vpack.c.bf16 %v423_v5, %v422_v4  ;;  %v424_v7 = vld [vmem:[%s2658_s4 + $0x30] sm:$0xff]  ;;  %v425_v8 = vld [vmem:[%s2658_s4 + $0x38] sm:$0xff]  ;;  %v426_v10 = vld [vmem:[%s2658_s4 + $0x40] sm:$0xff]  ;;  %657 = vst.msk [vmem:[#allocation3 + $0x48] sm:$0xff] %vm652_vm10, %v2021_v3 }
  0x10   :  { %1790 = vmatpush3.bf16.msra.mxu0 %v1787_v21  ;;  %1774 = vmatpush3.bf16.msra.mxu1 %v1771_v22  ;;  %v1821_v9 = vpack.c.bf16 %v425_v8, %v424_v7  ;;  %v427_v11 = vld [vmem:[%s2658_s4 + $0x48] sm:$0xff]  ;;  %v428_v13 = vld [vmem:[%s2658_s4 + $0x50] sm:$0xff]  ;;  %v429_v14 = vld [vmem:[%s2658_s4 + $0x58] sm:$0xff]  ;;  %646 = vst.msk [vmem:[#allocation3 + $0x20] sm:$0x1] %vm645_vm11, %v2021_v3 }
  0x11   :  { %1792 = vmatprep.subr.bf16.mxu0 %v1791_v27  ;;  %1776 = vmatprep.subr.bf16.mxu1 %v1775_v28  ;;  %v1824_v12 = vpack.c.bf16 %v427_v11, %v426_v10  ;;  %v1827_v15 = vpack.c.bf16 %v429_v14, %v428_v13  ;;  %v430_v16 = vld [vmem:[%s2658_s4 + $0x60] sm:$0xff]  ;;  %v431_v17 = vld [vmem:[%s2658_s4 + $0x68] sm:$0xff]  ;;  %v432_v19 = vld [vmem:[%s2658_s4 + $0x70] sm:$0xff]  ;;  %655 = vst.msk [vmem:[#allocation3 + $0x28] sm:$0x1] %vm654_vm12, %v2021_v3 }
  0x12   :  { %v1830_v18 = vpack.c.bf16 %v431_v17, %v430_v16  ;;  %v433_v20 = vld [vmem:[%s2658_s4 + $0x78] sm:$0xff]  ;;  %v1395_v5 = vld [vmem:[%s2659_s5 + $0x90] sm:$0xff]  ;;  %v1397_v7 = vld [vmem:[%s2659_s5 + $0xa0] sm:$0xff]  ;;  %649 = vst.msk [vmem:[#allocation3 + $0x50] sm:$0x1] %vm645_vm11, %v2021_v3 }
  0x13   :  { %v1833_v21 = vpack.c.bf16 %v433_v20, %v432_v19  ;;  %v1399_v11 = vld [vmem:[%s2659_s5 + $0xb0] sm:$0xff]  ;;  %v1401_v14 = vld [vmem:[%s2659_s5 + $0xc0] sm:$0xff]  ;;  %658 = vst.msk [vmem:[#allocation3 + $0x58] sm:$0x1] %vm654_vm12, %v2021_v3 }
  0x14   :  { %1794 = vmatpush3.bf16.msra.mxu0 %v1791_v27  ;;  %1778 = vmatpush3.bf16.msra.mxu1 %v1775_v28  ;;  %v1403_v17 = vld [vmem:[%s2659_s5 + $0xd0] sm:$0xff]  ;;  %v1405_v20 = vld [vmem:[%s2659_s5 + $0xe0] sm:$0xff] }
  0x15   :  { %1591 = vmatprep.subr.mxu0 %v84_v29  ;;  %1567 = vmatprep.subr.mxu1 %v1372_v30 }
  0x18   :  { %1592 = vmatpush3.msra.mxu0 %v84_v29  ;;  %1568 = vmatpush3.msra.mxu1 %v1372_v30 }
  0x19   :  { %1796 = vmatprep.subr.bf16.mxu0 %v1795_v33  ;;  %1811 = vmatprep.subr.bf16.mxu1 %v2023_v60 }
  0x74   :  { %v56_v34 = vpop.permute.xlu0 %55  ;;  %v60_v35 = vpop.permute.xlu1 %59 }
  0x75   :  { %68 = vst.msk [vmem:[#allocation2 + $0x1] sm:$0xff] %vm67_vm3, %v56_v34  ;;  %70 = vst.msk [vmem:[#allocation2 + $0x19] sm:$0xff] %vm67_vm3, %v60_v35 }
  0x78   :  { %v58_v36 = vpop.permute.xlu0 %57  ;;  %v62_v37 = vpop.permute.xlu1 %61 }
  0x79   :  { %69 = vst.msk [vmem:[#allocation2 + $0x9] sm:$0xff] %vm67_vm3, %v58_v36  ;;  %71 = vst.msk [vmem:[#allocation2 + $0x21] sm:$0xff] %vm67_vm3, %v62_v37  ;;  %vm998_vm3 = vcmask 1045504  }
  0x7c   :  { %v85_v39 = vld [vmem:[#allocation2 + $0x1] sm:$0xff]  ;;  %v74_v42 = vld [vmem:[#allocation2 + $0x18] sm:$0xff] }
  0x7d   :  { %v72_v40 = vld [vmem:[#allocation2] sm:$0xff]  ;;  %1569 = vmatprep.mubr.msk.f32.mxu1 %vm99_vm4, %v85_v39 }
  0x7e   :  { %1593 = vmatprep.mubr.msk.f32.mxu0 %vm99_vm4, %v72_v40  ;;  %v87_v48 = vld [vmem:[#allocation2 + $0x19] sm:$0xff] }
  0x80   :  { %v86_v46 = vld [vmem:[#allocation2 + $0x9] sm:$0xff]  ;;  %v75_v49 = vld [vmem:[#allocation2 + $0x20] sm:$0xff] }
  0x81   :  { %v73_v47 = vld [vmem:[#allocation2 + $0x8] sm:$0xff]  ;;  %1570 = vmatmul.mubr.msk.f32.vlgmr.msra.gmra.mrb[0].mxu1 %vm99_vm4, %v86_v46  ;;  %v296_v58 = vld [vmem:[#allocation2 + $0x1a] sm:$0xff] }
  0x82   :  { %1594 = vmatmul.mubr.msk.f32.vlgmr.msra.gmra.mrb[0].mxu0 %vm99_vm4, %v73_v47  ;;  %v88_v50 = vld [vmem:[#allocation2 + $0x21] sm:$0xff]  ;;  %1572 = vmatprep.mubr.msk.f32.mxu1 %vm99_vm4, %v87_v48  ;;  %v295_v57 = vld [vmem:[#allocation2 + $0xa] sm:$0xff] }
  0x83   :  { %1798 = vmatpush3.bf16.msra.mxu0 %v1795_v33  ;;  %1596 = vmatprep.mubr.msk.f32.mxu0 %vm99_vm4, %v74_v42  ;;  %v294_v54 = vld [vmem:[#allocation2 + $0x2] sm:$0xff] }
  0x84   :  { %1800 = vmatprep.subr.bf16.mxu0 %v1799_v43  ;;  %v297_v59 = vld [vmem:[#allocation2 + $0x22] sm:$0xff]  ;;  %1813 = vmatpush3.bf16.msra.mxu1 %v1812_v63 }
  0x85   :  { %1573 = vmatmul.mubr.msk.f32.gmra.mrb[2].mxu1 %vm99_vm4, %v88_v50  ;;  %1814 = vmatprep.subr.bf16.mxu1 %v2023_v60 }
  0x86   :  { %1597 = vmatmul.mubr.msk.f32.gmra.mrb[2].mxu0 %vm99_vm4, %v75_v49  ;;  %1655 = vmatprep.mubr.msk.f32.mxu1 %vm2024_vm5, %v2021_v3 }
  0x87   :  { %1802 = vmatpush3.bf16.msra.mxu0 %v1799_v43  ;;  %1617 = vmatprep.mubr.msk.f32.mxu0 %vm99_vm4, %v294_v54  ;;  %v505_v43 = vlaneseq }
  0x88   :  { %1804 = vmatprep.subr.bf16.mxu0 %v1803_v51  ;;  %1816 = vmatpush3.bf16.msra.mxu1 %v1815_v2 }
  0x89   :  { %1817 = vmatprep.subr.bf16.mxu1 %v2023_v60  ;;  %vm628_vm6 = vcmp.lt.s32.totalorder %v505_v43, 144  ;;  %v506_v44 = vshrl.u32 %v505_v43, 7  ;;  %v1412_v43 = vld [vmem:[%s2659_s5 + $0x118] sm:$0xff] }
  0x8a   :  { %630 = vst.msk [vmem:[#allocation3] ss:$8 sm:$0x3] %vm628_vm6, %v2021_v3  ;;  %633 = vst.msk [vmem:[#allocation3 + $0x30] ss:$8 sm:$0x3] %vm628_vm6, %v2021_v3 }
  0x8b   :  { %1806 = vmatpush3.bf16.msra.mxu0 %v1803_v51  ;;  %636 = vst.msk [vmem:[#allocation3 + $0x21] ss:$8 sm:$0x3] %vm628_vm6, %v2021_v3  ;;  %639 = vst.msk [vmem:[#allocation3 + $0x51] ss:$8 sm:$0x3] %vm628_vm6, %v2021_v3 }
  0x8c   :  { %1808 = vmatprep.subr.bf16.mxu0 %v1807_v55  ;;  %1819 = vmatpush3.bf16.msra.mxu1 %v1818_v6  ;;  %v2271_v45 = vsub.s32 0, %v506_v44 }
  0x8d   :  { %1820 = vmatprep.subr.bf16.mxu1 %v2023_v60 }
  0x8f   :  { %1810 = vmatpush3.bf16.msra.mxu0 %v1807_v55 }
  0x90   :  { %1615 = vmatprep.subr.mxu0 %v1389_v56  ;;  %1822 = vmatpush3.bf16.msra.mxu1 %v1821_v9 }
  0x91   :  { %1823 = vmatprep.subr.bf16.mxu1 %v2023_v60 }
  0x93   :  { %1616 = vmatpush3.msra.mxu0 %v1389_v56 }
  0x94   :  { %1618 = vmatmul.mubr.msk.f32.vlgmr.msra.gmra.mrb[0].mxu0 %vm99_vm4, %v295_v57  ;;  %1859 = vmatprep.subr.bf16.mxu0 %v2023_v60 }
  0x95   :  { %1620 = vmatprep.mubr.msk.f32.mxu0 %vm99_vm4, %v296_v58  ;;  %1825 = vmatpush3.bf16.msra.mxu1 %v1824_v12 }
  0x96   :  { %1826 = vmatprep.subr.bf16.mxu1 %v2023_v60 }
  0x98   :  { %1621 = vmatmul.mubr.msk.f32.gmra.mrb[2].mxu0 %vm99_vm4, %v297_v59 }
  0x99   :  { %1828 = vmatpush3.bf16.msra.mxu1 %v1827_v15 }
  0x9a   :  { %1829 = vmatprep.subr.bf16.mxu1 %v2023_v60 }
  0x9d   :  { %1831 = vmatpush3.bf16.msra.mxu1 %v1830_v18 }
  0x9e   :  { %1832 = vmatprep.subr.bf16.mxu1 %v2023_v60 }
  0xa1   :  { %1834 = vmatpush3.bf16.msra.mxu1 %v1833_v21 }
  0xa2   :  { %1835 = vmatprep.subr.bf16.mxu1 %v2023_v60 }
 0x154   :  { %v1571_v22 = vpop.f32.mrb[0].mxu1 }
 0x155   :  { %v178_v23 = vpop.f32.mrb[1].mxu1 }
 0x158   :  { %v1574_v24 = vpop.f32.mrb[2].mxu1 }
 0x159   :  { %v188_v25 = vpop.f32.mrb[3].mxu1 }
 0x167   :  { %v1619_v26 = vpop.f32.mrb[0].mxu0 }
 0x168   :  { %v1988_v27 = vadd.f32 %v1619_v26, %v1571_v22  ;;  %v386_v28 = vpop.f32.mrb[1].mxu0 }
 0x169   :  { %v1989_v29 = vadd.f32 %v386_v28, %v178_v23  ;;  %v1407_v28 = vld [vmem:[%s2659_s5 + $0xf0] sm:$0xff] }
 0x16b   :  { %v1622_v30 = vpop.f32.mrb[2].mxu0  ;;  %v409_v33 = vadd.f32 %v1989_v29, %v1988_v27 }
 0x16c   :  { %v1990_v31 = vadd.f32 %v1622_v30, %v1574_v24  ;;  %v396_v32 = vpop.f32.mrb[3].mxu0 }
 0x16d   :  { %v1991_v34 = vadd.f32 %v396_v32, %v188_v25 }
 0x16f   :  { %v410_v35 = vadd.f32 %v1991_v34, %v409_v33  ;;  %v1409_v33 = vld [vmem:[%s2659_s5 + $0x100] sm:$0xff] }
 0x171   :  { %v411_v36 = vadd.f32 %v1990_v31, %v410_v35 }
 0x173   :  { %v412_v37 = vrot.slane %v411_v36, 4 }
 0x175   :  { %v413_v38 = vadd.f32 %v412_v37, %v411_v36  ;;  %v1394_v37 = vld [vmem:[%s2661_s3] ss:$0 sm:$0xff]  ;;  %s2025_s3 = smov 8  }
 0x177   :  { %v414_v39 = vrot.slane %v413_v38, 2 }
 0x179   :  { %v415_v40 = vadd.f32 %v414_v39, %v413_v38 }
 0x17b   :  { %v416_v41 = vrot.slane %v415_v40, 1 }
 0x17d   :  { %v417_v42 = vadd.f32 %v416_v41, %v415_v40 }
 0x17f   :  { %1656 = vmatmul.mubr.f32.vlgmr.msra.gmra.mrb[4].mxu1 %v417_v42  ;;  %v1411_v42 = vld [vmem:[%s2659_s5 + $0x110] sm:$0xff] }
 0x180   :  { %1837 = vmatpush3.bf16.msra.mxu1 %v1812_v63  ;;  %1690 = vmatprep.mubr.msk.f32.mxu1 %vm2024_vm5, %v2021_v3 }
 0x181   :  { %1838 = vmatprep.subr.bf16.mxu1 %v2023_v60 }
 0x184   :  { %1840 = vmatpush3.bf16.msra.mxu1 %v1815_v2 }
 0x185   :  { %1841 = vmatprep.subr.bf16.mxu1 %v2023_v60 }
 0x188   :  { %1843 = vmatpush3.bf16.msra.mxu1 %v1818_v6  ;;  %v1396_v6 = vld [vmem:[%s2659_s5 + $0x98] sm:$0xff] }
 0x189   :  { %1844 = vmatprep.subr.bf16.mxu1 %v2023_v60  ;;  %v1860_v8 = vpack.c.bf16 %v1396_v6, %v1395_v5  ;;  %v711_v5 = vld [vmem:[%s2659_s5] sm:$0xff] }
 0x18b   :  { %1861 = vmatpush1.bf16.msra.mxu0 %v1860_v8 }
 0x18c   :  { %1846 = vmatpush3.bf16.msra.mxu1 %v1821_v9  ;;  %v1398_v9 = vld [vmem:[%s2659_s5 + $0xa8] sm:$0xff]  ;;  %1862 = vmatprep.subr.bf16.mxu0 %v2023_v60 }
 0x18d   :  { %1847 = vmatprep.subr.bf16.mxu1 %v2023_v60  ;;  %v1863_v10 = vpack.c.bf16 %v1398_v9, %v1397_v7  ;;  %v712_v9 = vld [vmem:[%s2659_s5 + $0x8] sm:$0xff] }
 0x18f   :  { %1864 = vmatpush1.bf16.msra.mxu0 %v1863_v10 }
 0x190   :  { %1849 = vmatpush3.bf16.msra.mxu1 %v1824_v12  ;;  %v1400_v12 = vld [vmem:[%s2659_s5 + $0xb8] sm:$0xff]  ;;  %1865 = vmatprep.subr.bf16.mxu0 %v2023_v60 }
 0x191   :  { %1850 = vmatprep.subr.bf16.mxu1 %v2023_v60  ;;  %v1866_v13 = vpack.c.bf16 %v1400_v12, %v1399_v11 }
 0x193   :  { %1867 = vmatpush1.bf16.msra.mxu0 %v1866_v13 }
 0x194   :  { %1852 = vmatpush3.bf16.msra.mxu1 %v1827_v15  ;;  %v1402_v15 = vld [vmem:[%s2659_s5 + $0xc8] sm:$0xff]  ;;  %1868 = vmatprep.subr.bf16.mxu0 %v2023_v60 }
 0x195   :  { %1853 = vmatprep.subr.bf16.mxu1 %v2023_v60  ;;  %v1869_v16 = vpack.c.bf16 %v1402_v15, %v1401_v14 }
 0x197   :  { %1870 = vmatpush1.bf16.msra.mxu0 %v1869_v16 }
 0x198   :  { %1855 = vmatpush3.bf16.msra.mxu1 %v1830_v18  ;;  %v1404_v18 = vld [vmem:[%s2659_s5 + $0xd8] sm:$0xff]  ;;  %1871 = vmatprep.subr.bf16.mxu0 %v2023_v60 }
 0x199   :  { %1856 = vmatprep.subr.bf16.mxu1 %v2023_v60  ;;  %v1872_v19 = vpack.c.bf16 %v1404_v18, %v1403_v17  ;;  %v1887_v17 = vpack.c.bf16 %v712_v9, %v711_v5  ;;  %v713_v18 = vld [vmem:[%s2659_s5 + $0x10] sm:$0xff]  ;;  %v728_v5 = vld [vmem:[%s2659_s5 + $0x88] sm:$0xff] }
 0x19b   :  { %1873 = vmatpush1.bf16.msra.mxu0 %v1872_v19 }
 0x19c   :  { %1858 = vmatpush3.bf16.msra.mxu1 %v1833_v21  ;;  %v1406_v21 = vld [vmem:[%s2659_s5 + $0xe8] sm:$0xff]  ;;  %1874 = vmatprep.subr.bf16.mxu0 %v2023_v60 }
 0x19d   :  { %1940 = vmatprep.subr.bf16.mxu1 %v2023_v60  ;;  %v1875_v22 = vpack.c.bf16 %v1406_v21, %v1405_v20 }
 0x19f   :  { %1876 = vmatpush1.bf16.msra.mxu0 %v1875_v22 }
 0x1a0   :  { %1877 = vmatprep.subr.bf16.mxu0 %v2023_v60 }
 0x252   :  { %v500_v46 = vpop.f32.mrb[4].mxu1 }
 0x253   :  { %v504_v47 = vmul.f32 0.001953125, %v500_v46  ;;  %v1657_v48 = vpop.f32.mrb[5].mxu1 }
 0x255   :  { %v508_v49 = vrot.slane %v504_v47, %v2271_v45 }
 0x257   :  { %v2274_v50 = vsub.f32 %v1989_v29, %v508_v49  ;;  %v2276_v51 = vsub.f32 %v1988_v27, %v508_v49  ;;  %v2278_v52 = vsub.f32 %v1991_v34, %v508_v49  ;;  %v2280_v53 = vsub.f32 %v1990_v31, %v508_v49  ;;  %v597_v27 = vld [vmem:[%s2660_s2] sm:$0x1]  ;;  %v1408_v29 = vld [vmem:[%s2659_s5 + $0xf8] sm:$0xff]  ;;  %v1410_v34 = vld [vmem:[%s2659_s5 + $0x108] sm:$0xff] }
 0x258   :  { %v1878_v30 = vpack.c.bf16 %v1408_v29, %v1407_v28  ;;  %v1881_v36 = vpack.c.bf16 %v1410_v34, %v1409_v33  ;;  %v1884_v49 = vpack.c.bf16 %v1412_v43, %v1411_v42  ;;  %v715_v29 = vld [vmem:[%s2659_s5 + $0x20] sm:$0xff] }
 0x259   :  { %v513_v54 = vmul.f32 %v2274_v50, %v2274_v50  ;;  %v514_v55 = vmul.f32 %v2276_v51, %v2276_v51  ;;  %v515_v56 = vmul.f32 %v2278_v52, %v2278_v52  ;;  %v516_v58 = vmul.f32 %v2280_v53, %v2280_v53 }
 0x25a   :  { %1879 = vmatpush1.bf16.msra.mxu0 %v1878_v30  ;;  %v716_v30 = vld [vmem:[%s2659_s5 + $0x28] sm:$0xff] }
 0x25b   :  { %v517_v57 = vadd.f32 %v514_v55, %v513_v54  ;;  %1880 = vmatprep.subr.bf16.mxu0 %v2023_v60  ;;  %v1893_v43 = vpack.c.bf16 %v716_v30, %v715_v29  ;;  %v1431_v30 = vld [vmem:[%s2659_s5 + $0x170] sm:$0xff] }
 0x25d   :  { %v518_v59 = vadd.f32 %v517_v57, %v515_v56 }
 0x25e   :  { %1882 = vmatpush1.bf16.msra.mxu0 %v1881_v36 }
 0x25f   :  { %v519_v61 = vadd.f32 %v518_v59, %v516_v58  ;;  %1883 = vmatprep.subr.bf16.mxu0 %v2023_v60 }
 0x261   :  { %v520_v62 = vrot.slane %v519_v61, 4 }
 0x262   :  { %1885 = vmatpush1.bf16.msra.mxu0 %v1884_v49 }
 0x263   :  { %v521_v63 = vadd.f32 %v520_v62, %v519_v61  ;;  %1886 = vmatprep.subr.bf16.mxu0 %v2023_v60  ;;  %v1148_v61 = vld [vmem:[%s2662_s8] sm:$0xff]  ;;  %v1149_v62 = vld [vmem:[%s2662_s8 + $0x8] sm:$0xff] }
 0x265   :  { %v522_v0 = vrot.slane %v521_v63, 2 }
 0x267   :  { %v523_v1 = vadd.f32 %v522_v0, %v521_v63  ;;  %v2390_v63 = vpack.c.bf16 %v1149_v62, %v1148_v61  ;;  %v724_v61 = vld [vmem:[%s2659_s5 + $0x68] sm:$0xff] }
 0x269   :  { %v524_v2 = vrot.slane %v523_v1, 1 }
 0x26b   :  { %v525_v4 = vadd.f32 %v524_v2, %v523_v1 }
 0x26d   :  { %1691 = vmatmul.mubr.f32.vlgmr.msra.gmra.mrb[6].mxu1 %v525_v4 }
 0x26e   :  { %1725 = vmatprep.mubr.msk.f32.mxu1 %vm2024_vm5, %v2021_v3  ;;  %1942 = vmatpush3.bf16.msra.mxu1 %v2390_v63 }
 0x26f   :  { %1943 = vmatprep.subr.bf16.mxu1 %v2023_v60 }
 0x340   :  { %v592_v23 = vpop.f32.mrb[6].mxu1 }
 0x341   :  { %v596_v24 = vmul.f32 0.001953125, %v592_v23  ;;  %v1692_v25 = vpop.f32.mrb[7].mxu1  ;;  %v714_v23 = vld [vmem:[%s2659_s5 + $0x18] sm:$0xff] }
 0x342   :  { %v1890_v28 = vpack.c.bf16 %v714_v23, %v713_v18 }
 0x343   :  { %v598_v26 = vadd.f32 1e-05, %v596_v24 }
 0x345   :  { %2017 = vrsqrt.f32 %v598_v26 }
 0x34f   :  { %v2018_v31 = vpop.eup %2017 }
 0x350   :  { %v600_v32 = vmul.f32 %v2018_v31, %v597_v27 }
 0x352   :  { %v605_v35 = vrot.slane %v600_v32, %v2271_v45 }
 0x354   :  { %v607_v38 = vmul.f32 %v605_v35, %v2274_v50  ;;  %v608_v39 = vmul.f32 %v605_v35, %v2276_v51  ;;  %v609_v40 = vmul.f32 %v605_v35, %v2278_v52  ;;  %v610_v41 = vmul.f32 %v605_v35, %v2280_v53 }
 0x356   :  { %v618_v44 = vadd.f32 %v1394_v37, %v607_v38  ;;  %v619_v46 = vadd.f32 %v1394_v37, %v608_v39  ;;  %v620_v47 = vadd.f32 %v1394_v37, %v609_v40  ;;  %v621_v48 = vadd.f32 %v1394_v37, %v610_v41 }
 0x358   :  { %v622_v50 = vmax.f32 %v618_v44, 0.0  ;;  %v623_v51 = vmax.f32 %v619_v46, 0.0  ;;  %v624_v54 = vmax.f32 %v620_v47, 0.0  ;;  %v625_v55 = vmax.f32 %v621_v48, 0.0  ;;  %v717_v44 = vld [vmem:[%s2659_s5 + $0x30] sm:$0xff]  ;;  %v718_v46 = vld [vmem:[%s2659_s5 + $0x38] sm:$0xff] }
 0x35a   :  { %v664_v52 = vrot.slane %v622_v50, 7  ;;  %v665_v53 = vrot.slane %v623_v51, 7  ;;  %v667_v57 = vrot.slane %v624_v54, 7  ;;  %v668_v58 = vrot.slane %v625_v55, 7  ;;  %v719_v51 = vld [vmem:[%s2659_s5 + $0x40] sm:$0xff] }
 0x35b   :  { %v1896_v50 = vpack.c.bf16 %v718_v46, %v717_v44 }
 0x35c   :  { %670 = vrot.lane.b32.xlu0 %v664_v52, %s2025_s3  ;;  %v666_v56 = vsel %vm663_vm13, %v664_v52, %v665_v53  ;;  %v669_v59 = vsel %vm663_vm13, %v667_v57, %v668_v58  ;;  %v720_v52 = vld [vmem:[%s2659_s5 + $0x48] sm:$0xff] }
 0x35d   :  { %672 = vrot.lane.b32.xlu1 %v666_v56, %s2025_s3  ;;  %v1899_v55 = vpack.c.bf16 %v720_v52, %v719_v51  ;;  %v721_v56 = vld [vmem:[%s2659_s5 + $0x50] sm:$0xff] }
 0x360   :  { %674 = vrot.lane.b32.xlu0 %v665_v53, %s2025_s3 }
 0x361   :  { %676 = vrot.lane.b32.xlu1 %v667_v57, %s2025_s3  ;;  %v722_v57 = vld [vmem:[%s2659_s5 + $0x58] sm:$0xff] }
 0x364   :  { %678 = vrot.lane.b32.xlu0 %v669_v59, %s2025_s3  ;;  %v723_v59 = vld [vmem:[%s2659_s5 + $0x60] sm:$0xff] }
 0x365   :  { %680 = vrot.lane.b32.xlu1 %v668_v58, %s2025_s3  ;;  %v1902_v58 = vpack.c.bf16 %v722_v57, %v721_v56  ;;  %v1905_v62 = vpack.c.bf16 %v724_v61, %v723_v59 }
 0x3ce   :  { %v671_v0 = vpop.permute.xlu0 %670 }
 0x3cf   :  { %689 = vst.msk [vmem:[#allocation3] sm:$0xfe] %vm688_vm14, %v671_v0  ;;  %v673_v1 = vpop.permute.xlu1 %672 }
 0x3d0   :  { %690 = vst.msk [vmem:[#allocation3 + $0x8] sm:$0xfe] %vm641_vm7, %v671_v0  ;;  %v725_v0 = vld [vmem:[%s2659_s5 + $0x70] sm:$0xff] }
 0x3d1   :  { %692 = vst.msk [vmem:[#allocation3 + $0x10] sm:$0xff] %vm691_vm15, %v673_v1 }
 0x3d2   :  { %693 = vst.msk [vmem:[#allocation3 + $0x18] sm:$0xff] %vm643_vm9, %v673_v1  ;;  %v675_v2 = vpop.permute.xlu0 %674  ;;  %v726_v1 = vld [vmem:[%s2659_s5 + $0x78] sm:$0xff] }
 0x3d3   :  { %695 = vst.msk [vmem:[#allocation3 + $0x20] sm:$0x1] %vm694_vm0, %v675_v2  ;;  %v677_v4 = vpop.permute.xlu1 %676 }
 0x3d4   :  { %696 = vst.msk [vmem:[#allocation3 + $0x28] sm:$0x1] %vm645_vm11, %v675_v2  ;;  %v1908_v2 = vpack.c.bf16 %v726_v1, %v725_v0 }
 0x3d5   :  { %697 = vst.msk [vmem:[#allocation3 + $0x30] sm:$0xfe] %vm688_vm14, %v677_v4 }
 0x3d6   :  { %698 = vst.msk [vmem:[#allocation3 + $0x38] sm:$0xfe] %vm641_vm7, %v677_v4  ;;  %v679_v6 = vpop.permute.xlu0 %678  ;;  %v729_v8 = vld [vmem:[#allocation3] sm:$0xfe]  ;;  %v727_v4 = vld [vmem:[%s2659_s5 + $0x80] sm:$0xff] }
 0x3d7   :  { %v730_v7 = vld [vmem:[#allocation3 + $0x8] sm:$0xfe]  ;;  %699 = vst.msk [vmem:[#allocation3 + $0x40] sm:$0xff] %vm691_vm15, %v679_v6  ;;  %v681_v10 = vpop.permute.xlu1 %680  ;;  %v750_v14 = vrot.slane %v729_v8, 1  ;;  %v1422_v8 = vld [vmem:[%s2659_s5 + $0x128] sm:$0xff] }
 0x3d8   :  { %700 = vst.msk [vmem:[#allocation3 + $0x48] sm:$0xff] %vm643_vm9, %v679_v6  ;;  %v753_v12 = vrot.slane %v730_v7, 1  ;;  %v2410_v13 = vld [vmem:[#allocation3 + $0x10] sm:$0xff]  ;;  %v704_v54 = vld [vmem:[#allocation3 + $0x8] sm:$0xff]  ;;  %v1911_v6 = vpack.c.bf16 %v728_v5, %v727_v4 }
 0x3d9   :  { %v2408_v11 = vld [vmem:[#allocation3 + $0x18] sm:$0xff]  ;;  %701 = vst.msk [vmem:[#allocation3 + $0x50] sm:$0x1] %vm694_vm0, %v681_v10  ;;  %v751_v16 = vrot.slane %v2410_v13, 1  ;;  %v1421_v7 = vld [vmem:[%s2659_s5 + $0x120] sm:$0xff] }
 0x3da   :  { %702 = vst.msk [vmem:[#allocation3 + $0x58] sm:$0x1] %vm645_vm11, %v681_v10  ;;  %v754_v15 = vrot.slane %v2408_v11, 1  ;;  %v731_v22 = vld [vmem:[#allocation3 + $0x20] sm:$0x1]  ;;  %v1914_v9 = vpack.c.bf16 %v1422_v8, %v1421_v7  ;;  %v1152_v8 = vld [vmem:[%s2662_s8 + $0x20] sm:$0xff] }
 0x3db   :  { %v752_v20 = vsel %vm749_vm1, %v750_v14, %v751_v16  ;;  %v732_v21 = vld [vmem:[#allocation3 + $0x28] sm:$0x1]  ;;  %v756_v25 = vrot.slane %v731_v22, 1  ;;  %v1423_v10 = vld [vmem:[%s2659_s5 + $0x130] sm:$0xff] }
 0x3dc   :  { %v755_v19 = vsel %vm749_vm1, %v753_v12, %v754_v15  ;;  %v758_v24 = vrot.slane %v732_v21, 1  ;;  %v733_v33 = vld [vmem:[#allocation3 + $0x30] sm:$0xfe]  ;;  %v1424_v12 = vld [vmem:[%s2659_s5 + $0x138] sm:$0xff]  ;;  %v703_v14 = vld [vmem:[#allocation3] sm:$0xff] }
 0x3dd   :  { %1413 = vmatprep.mubr.msk.f32.mxu0 %vm793_vm2, %v755_v19  ;;  %v734_v26 = vld [vmem:[#allocation3 + $0x38] sm:$0xfe]  ;;  %v757_v34 = vsel %vm749_vm1, %v751_v16, %v756_v25  ;;  %v760_v42 = vrot.slane %v733_v33, 1  ;;  %v1425_v16 = vld [vmem:[%s2659_s5 + $0x140] sm:$0xff]  ;;  %v1427_v21 = vld [vmem:[%s2659_s5 + $0x150] sm:$0xff]  ;;  %v1003_v25 = vrot.slane %v2408_v11, 2 }
 0x3de   :  { %867 = vmatmul.mubr.f32.vlgmr.msra.gmra.mrb[4].mxu0 %v752_v20  ;;  %v759_v27 = vsel %vm749_vm1, %v754_v15, %v758_v24  ;;  %v2436_v32 = vld [vmem:[#allocation3 + $0x40] sm:$0xff]  ;;  %v763_v35 = vrot.slane %v734_v26, 1  ;;  %v1917_v15 = vpack.c.bf16 %v1424_v12, %v1423_v10  ;;  %v708_v18 = vld [vmem:[#allocation3 + $0x38] sm:$0xff]  ;;  %v983_v20 = vld [vmem:[#allocation3 + $0x8] sm:$0xfc] }
 0x3df   :  { %1888 = vmatpush1.bf16.msra.mxu0 %v1887_v17  ;;  %1414 = vmatprep.mubr.msk.f32.mxu0 %vm793_vm2, %v759_v27  ;;  %v2434_v31 = vld [vmem:[#allocation3 + $0x48] sm:$0xff]  ;;  %v761_v37 = vrot.slane %v2436_v32, 1  ;;  %v1426_v17 = vld [vmem:[%s2659_s5 + $0x148] sm:$0xff]  ;;  %v707_v23 = vld [vmem:[#allocation3 + $0x30] sm:$0xff]  ;;  %v1002_v24 = vrot.slane %v983_v20, 2 }
 0x3e0   :  { %1889 = vmatprep.subr.bf16.mxu0 %v2023_v60  ;;  %v764_v36 = vrot.slane %v2434_v31, 1  ;;  %v735_v40 = vld [vmem:[#allocation3 + $0x50] sm:$0x1]  ;;  %v1920_v19 = vpack.c.bf16 %v1426_v17, %v1425_v16  ;;  %v1428_v22 = vld [vmem:[%s2659_s5 + $0x158] sm:$0xff]  ;;  %v1154_v12 = vld [vmem:[%s2662_s8 + $0x30] sm:$0xff] }
 0x3e1   :  { %v736_v38 = vld [vmem:[#allocation3 + $0x58] sm:$0x1]  ;;  %v762_v47 = vsel %vm749_vm1, %v760_v42, %v761_v37  ;;  %v766_v48 = vrot.slane %v735_v40, 1  ;;  %v1923_v26 = vpack.c.bf16 %v1428_v22, %v1427_v21  ;;  %v1429_v27 = vld [vmem:[%s2659_s5 + $0x160] sm:$0xff]  ;;  %v1432_v33 = vld [vmem:[%s2659_s5 + $0x178] sm:$0xff] }
 0x3e2   :  { %872 = vmatmul.mubr.f32.gmra.mrb[6].mxu0 %v757_v34  ;;  %v768_v39 = vrot.slane %v736_v38, 1  ;;  %v765_v41 = vsel %vm749_vm1, %v763_v35, %v764_v36  ;;  %v1929_v34 = vpack.c.bf16 %v1432_v33, %v1431_v30  ;;  %v1433_v35 = vld [vmem:[%s2659_s5 + $0x180] sm:$0xff]  ;;  %v1435_v38 = vld [vmem:[%s2659_s5 + $0x190] sm:$0xff]  ;;  %v1438_v42 = vld [vmem:[%s2659_s5 + $0x1a8] sm:$0xff] }
 0x3e3   :  { %1891 = vmatpush1.bf16.msra.mxu0 %v1890_v28  ;;  %1415 = vmatprep.mubr.msk.f32.mxu0 %vm793_vm2, %v765_v41  ;;  %v767_v53 = vsel %vm749_vm1, %v761_v37, %v766_v48  ;;  %v1430_v28 = vld [vmem:[%s2659_s5 + $0x168] sm:$0xff]  ;;  %v1437_v41 = vld [vmem:[%s2659_s5 + $0x1a0] sm:$0xff]  ;;  %v985_v46 = vld [vmem:[#allocation3 + $0x28] sm:$0x3]  ;;  %v1000_v48 = vrot.slane %v2410_v13, 2 }
 0x3e4   :  { %1892 = vmatprep.subr.bf16.mxu0 %v2023_v60  ;;  %v769_v49 = vsel %vm749_vm1, %v764_v36, %v768_v39  ;;  %v1926_v29 = vpack.c.bf16 %v1430_v28, %v1429_v27  ;;  %v1434_v36 = vld [vmem:[%s2659_s5 + $0x188] sm:$0xff]  ;;  %v1436_v39 = vld [vmem:[%s2659_s5 + $0x198] sm:$0xff]  ;;  %v1938_v44 = vpack.c.bf16 %v1438_v42, %v1437_v41  ;;  %v988_v0 = vld [vmem:[#allocation3 + $0x50] sm:$0x3] }
 0x3e5   :  { %v1932_v37 = vpack.c.bf16 %v1434_v36, %v1433_v35  ;;  %v1935_v40 = vpack.c.bf16 %v1436_v39, %v1435_v38  ;;  %v989_v56 = vld [vmem:[#allocation3 + $0x58] sm:$0x3]  ;;  %v1156_v16 = vld [vmem:[%s2662_s8 + $0x40] sm:$0xff]  ;;  %v1159_v20 = vld [vmem:[%s2662_s8 + $0x58] sm:$0xff] }
 0x3e6   :  { %877 = vmatmul.mubr.f32.gmra.mrb[8].mxu0 %v762_v47  ;;  %v1157_v17 = vld [vmem:[%s2662_s8 + $0x48] sm:$0xff]  ;;  %v1160_v22 = vld [vmem:[%s2662_s8 + $0x60] sm:$0xff] }
 0x3e7   :  { %1894 = vmatpush1.bf16.msra.mxu0 %v1893_v43  ;;  %1416 = vmatprep.mubr.msk.f32.mxu0 %vm793_vm2, %v769_v49  ;;  %v982_v43 = vld [vmem:[#allocation3] sm:$0xfc]  ;;  %v1007_v49 = vrot.slane %v985_v46, 2 }
 0x3e8   :  { %1895 = vmatprep.subr.bf16.mxu0 %v2023_v60  ;;  %v999_v47 = vrot.slane %v982_v43, 2 }
 0x3ea   :  { %882 = vmatmul.mubr.f32.gmra.mrb[10].mxu0 %v767_v53  ;;  %v1001_v51 = vsel %vm998_vm3, %v999_v47, %v1000_v48  ;;  %v987_v53 = vld [vmem:[#allocation3 + $0x38] sm:$0xfc] }
 0x3eb   :  { %1897 = vmatpush1.bf16.msra.mxu0 %v1896_v50  ;;  %1417 = vmatprep.mubr.msk.f32.mxu0 %vm793_vm2, %v704_v54  ;;  %v984_v50 = vld [vmem:[#allocation3 + $0x20] sm:$0x3]  ;;  %v1008_v54 = vsel %vm998_vm3, %v1003_v25, %v1007_v49  ;;  %v1012_v57 = vrot.slane %v987_v53, 2 }
 0x3ec   :  { %1898 = vmatprep.subr.bf16.mxu0 %v2023_v60  ;;  %v1005_v52 = vrot.slane %v984_v50, 2 }
 0x3ee   :  { %v1006_v59 = vsel %vm998_vm3, %v1000_v48, %v1005_v52 }
 0x3ef   :  { %1900 = vmatpush1.bf16.msra.mxu0 %v1899_v55  ;;  %v1013_v55 = vrot.slane %v2434_v31, 2 }
 0x3f0   :  { %1901 = vmatprep.subr.bf16.mxu0 %v2023_v60 }
 0x3f1   :  { %v1014_v61 = vsel %vm998_vm3, %v1012_v57, %v1013_v55 }
 0x3f3   :  { %1903 = vmatpush1.bf16.msra.mxu0 %v1902_v58  ;;  %v986_v58 = vld [vmem:[#allocation3 + $0x30] sm:$0xfc] }
 0x3f4   :  { %1904 = vmatprep.subr.bf16.mxu0 %v2023_v60  ;;  %v1009_v1 = vrot.slane %v986_v58, 2 }
 0x3f7   :  { %1906 = vmatpush1.bf16.msra.mxu0 %v1905_v62  ;;  %v1017_v62 = vrot.slane %v989_v56, 2 }
 0x3f8   :  { %1907 = vmatprep.subr.bf16.mxu0 %v2023_v60 }
 0x3f9   :  { %v1018_v4 = vsel %vm998_vm3, %v1013_v55, %v1017_v62 }
 0x3fb   :  { %1909 = vmatpush1.bf16.msra.mxu0 %v1908_v2 }
 0x3fc   :  { %1910 = vmatprep.subr.bf16.mxu0 %v2023_v60 }
 0x3ff   :  { %1912 = vmatpush1.bf16.msra.mxu0 %v1911_v6  ;;  %v1151_v6 = vld [vmem:[%s2662_s8 + $0x18] sm:$0xff] }
 0x400   :  { %1913 = vmatprep.subr.bf16.mxu0 %v2023_v60 }
 0x402   :  { %962 = vmatmul.mubr.f32.vlgmr.msra.gmra.mrb[4].mxu0 %v703_v14  ;;  %v1155_v14 = vld [vmem:[%s2662_s8 + $0x38] sm:$0xff] }
 0x403   :  { %1418 = vmatprep.mubr.msk.f32.mxu0 %vm793_vm2, %v2408_v11  ;;  %1915 = vmatpush1.bf16.msra.mxu0 %v1914_v9  ;;  %v1004_v11 = vsel %vm998_vm3, %v1002_v24, %v1003_v25  ;;  %v1153_v9 = vld [vmem:[%s2662_s8 + $0x28] sm:$0xff]  ;;  %v1162_v25 = vld [vmem:[%s2662_s8 + $0x70] sm:$0xff] }
 0x404   :  { %1916 = vmatprep.subr.bf16.mxu0 %v2023_v60  ;;  %v1947_v10 = vpack.c.bf16 %v1153_v9, %v1152_v8  ;;  %v1443_v9 = vld [vmem:[%s2664_s7] ss:$0 sm:$0xff] }
 0x406   :  { %967 = vmatmul.mubr.f32.gmra.mrb[6].mxu0 %v2410_v13  ;;  %v1010_v13 = vrot.slane %v2436_v32, 2 }
 0x407   :  { %1419 = vmatprep.mubr.msk.f32.mxu0 %vm793_vm2, %v708_v18  ;;  %1918 = vmatpush1.bf16.msra.mxu0 %v1917_v15  ;;  %v1950_v15 = vpack.c.bf16 %v1155_v14, %v1154_v12  ;;  %v1953_v18 = vpack.c.bf16 %v1157_v17, %v1156_v16 }
 0x408   :  { %1919 = vmatprep.subr.bf16.mxu0 %v2023_v60  ;;  %v1011_v2 = vsel %vm998_vm3, %v1009_v1, %v1010_v13 }
 0x40a   :  { %972 = vmatmul.mubr.f32.gmra.mrb[8].mxu0 %v707_v23  ;;  %v1161_v23 = vld [vmem:[%s2662_s8 + $0x68] sm:$0xff] }
 0x40b   :  { %1420 = vmatprep.mubr.msk.f32.mxu0 %vm793_vm2, %v2434_v31  ;;  %1921 = vmatpush1.bf16.msra.mxu0 %v1920_v19  ;;  %v1015_v31 = vrot.slane %v988_v0, 2  ;;  %v1158_v19 = vld [vmem:[%s2662_s8 + $0x50] sm:$0xff]  ;;  %v1959_v24 = vpack.c.bf16 %v1161_v23, %v1160_v22 }
 0x40c   :  { %1922 = vmatprep.subr.bf16.mxu0 %v2023_v60  ;;  %v1956_v21 = vpack.c.bf16 %v1159_v20, %v1158_v19 }
 0x40d   :  { %v1016_v5 = vsel %vm998_vm3, %v1010_v13, %v1015_v31 }
 0x40e   :  { %977 = vmatmul.mubr.f32.gmra.mrb[10].mxu0 %v2436_v32  ;;  %v1150_v32 = vld [vmem:[%s2662_s8 + $0x10] sm:$0xff] }
 0x40f   :  { %1924 = vmatpush1.bf16.msra.mxu0 %v1923_v26  ;;  %1439 = vmatprep.mubr.msk.f32.mxu0 %vm793_vm2, %v1004_v11  ;;  %v1944_v7 = vpack.c.bf16 %v1151_v6, %v1150_v32  ;;  %v1163_v26 = vld [vmem:[%s2662_s8 + $0x78] sm:$0xff]  ;;  %v1327_v32 = vld [vmem:[%s2663_s6] sm:$0x1] }
 0x410   :  { %1925 = vmatprep.subr.bf16.mxu0 %v2023_v60  ;;  %v1962_v27 = vpack.c.bf16 %v1163_v26, %v1162_v25 }
 0x411   :  { %1945 = vmatpush3.bf16.msra.mxu1 %v1944_v7 }
 0x412   :  { %1946 = vmatprep.subr.bf16.mxu1 %v2023_v60 }
 0x413   :  { %1927 = vmatpush1.bf16.msra.mxu0 %v1926_v29 }
 0x414   :  { %1928 = vmatprep.subr.bf16.mxu0 %v2023_v60 }
 0x415   :  { %1948 = vmatpush3.bf16.msra.mxu1 %v1947_v10 }
 0x416   :  { %1949 = vmatprep.subr.bf16.mxu1 %v2023_v60 }
 0x417   :  { %1930 = vmatpush1.bf16.msra.mxu0 %v1929_v34 }
 0x418   :  { %1931 = vmatprep.subr.bf16.mxu0 %v2023_v60 }
 0x419   :  { %1951 = vmatpush3.bf16.msra.mxu1 %v1950_v15 }
 0x41a   :  { %1952 = vmatprep.subr.bf16.mxu1 %v2023_v60 }
 0x41b   :  { %1933 = vmatpush1.bf16.msra.mxu0 %v1932_v37 }
 0x41c   :  { %1934 = vmatprep.subr.bf16.mxu0 %v2023_v60 }
 0x41d   :  { %1954 = vmatpush3.bf16.msra.mxu1 %v1953_v18 }
 0x41e   :  { %1955 = vmatprep.subr.bf16.mxu1 %v2023_v60 }
 0x41f   :  { %1936 = vmatpush1.bf16.msra.mxu0 %v1935_v40 }
 0x420   :  { %1937 = vmatprep.subr.bf16.mxu0 %v2023_v60 }
 0x421   :  { %1957 = vmatpush3.bf16.msra.mxu1 %v1956_v21 }
 0x422   :  { %1958 = vmatprep.subr.bf16.mxu1 %v2023_v60 }
 0x423   :  { %1939 = vmatpush1.bf16.msra.mxu0 %v1938_v44 }
 0x425   :  { %1960 = vmatpush3.bf16.msra.mxu1 %v1959_v24 }
 0x426   :  { %1115 = vmatmul.mubr.f32.vlgmr.msra.gmra.mrb[4].mxu0 %v1001_v51  ;;  %1961 = vmatprep.subr.bf16.mxu1 %v2023_v60 }
 0x427   :  { %1440 = vmatprep.mubr.msk.f32.mxu0 %vm793_vm2, %v1008_v54 }
 0x429   :  { %1963 = vmatpush3.bf16.msra.mxu1 %v1962_v27 }
 0x42a   :  { %1120 = vmatmul.mubr.f32.gmra.mrb[6].mxu0 %v1006_v59  ;;  %1964 = vmatprep.subr.bf16.mxu1 %v2023_v60 }
 0x42b   :  { %1441 = vmatprep.mubr.msk.f32.mxu0 %vm793_vm2, %v1014_v61 }
 0x42e   :  { %1125 = vmatmul.mubr.f32.gmra.mrb[8].mxu0 %v1011_v2 }
 0x42f   :  { %1442 = vmatprep.mubr.msk.f32.mxu0 %vm793_vm2, %v1018_v4 }
 0x432   :  { %1130 = vmatmul.mubr.f32.gmra.mrb[10].mxu0 %v1016_v5 }
 0x4f9   :  { %v1116_v28 = vpop.f32.mrb[4].mxu0 }
 0x4fa   :  { %v1118_v11 = vpop.f32.mrb[5].mxu0 }
 0x4fd   :  { %v1121_v29 = vpop.f32.mrb[6].mxu0 }
 0x4fe   :  { %v1139_v30 = vadd.f32 %v1121_v29, %v1116_v28  ;;  %v1123_v33 = vpop.f32.mrb[7].mxu0 }
 0x501   :  { %v1126_v34 = vpop.f32.mrb[8].mxu0 }
 0x502   :  { %v1140_v35 = vadd.f32 %v1139_v30, %v1126_v34  ;;  %v1128_v36 = vpop.f32.mrb[9].mxu0 }
 0x505   :  { %v1131_v37 = vpop.f32.mrb[10].mxu0 }
 0x506   :  { %v1141_v38 = vadd.f32 %v1140_v35, %v1131_v37  ;;  %v1133_v39 = vpop.f32.mrb[11].mxu0 }
 0x508   :  { %v1142_v40 = vrot.slane %v1141_v38, 4 }
 0x50a   :  { %v1143_v41 = vadd.f32 %v1142_v40, %v1141_v38 }
 0x50c   :  { %v1144_v42 = vrot.slane %v1143_v41, 2 }
 0x50e   :  { %v1145_v43 = vadd.f32 %v1144_v42, %v1143_v41 }
 0x510   :  { %v1146_v44 = vrot.slane %v1145_v43, 1 }
 0x512   :  { %v1147_v46 = vadd.f32 %v1146_v44, %v1145_v43 }
 0x514   :  { %1726 = vmatmul.mubr.f32.vlgmr.msra.gmra.mrb[8].mxu1 %v1147_v46 }
 0x515   :  { %1966 = vmatpush3.bf16.msra.mxu1 %v2390_v63  ;;  %1760 = vmatprep.mubr.msk.f32.mxu1 %vm2024_vm5, %v2021_v3 }
 0x516   :  { %1967 = vmatprep.subr.bf16.mxu1 %v2023_v60 }
 0x519   :  { %1969 = vmatpush3.bf16.msra.mxu1 %v1944_v7 }
 0x51a   :  { %1970 = vmatprep.subr.bf16.mxu1 %v2023_v60 }
 0x51d   :  { %1972 = vmatpush3.bf16.msra.mxu1 %v1947_v10 }
 0x51e   :  { %1973 = vmatprep.subr.bf16.mxu1 %v2023_v60 }
 0x521   :  { %1975 = vmatpush3.bf16.msra.mxu1 %v1950_v15 }
 0x522   :  { %1976 = vmatprep.subr.bf16.mxu1 %v2023_v60 }
 0x525   :  { %1978 = vmatpush3.bf16.msra.mxu1 %v1953_v18 }
 0x526   :  { %1979 = vmatprep.subr.bf16.mxu1 %v2023_v60 }
 0x529   :  { %1981 = vmatpush3.bf16.msra.mxu1 %v1956_v21 }
 0x52a   :  { %1982 = vmatprep.subr.bf16.mxu1 %v2023_v60 }
 0x52d   :  { %1984 = vmatpush3.bf16.msra.mxu1 %v1959_v24 }
 0x52e   :  { %1985 = vmatprep.subr.bf16.mxu1 %v2023_v60 }
 0x531   :  { %1987 = vmatpush3.bf16.msra.mxu1 %v1962_v27 }
 0x5e7   :  { %v1230_v3 = vpop.f32.mrb[8].mxu1 }
 0x5e8   :  { %v1234_v63 = vmul.f32 0.001953125, %v1230_v3  ;;  %v1727_v47 = vpop.f32.mrb[9].mxu1 }
 0x5ea   :  { %v1238_v48 = vrot.slane %v1234_v63, %v2271_v45 }
 0x5ec   :  { %v1239_v49 = vsub.f32 %v1116_v28, %v1238_v48  ;;  %v1240_v50 = vsub.f32 %v1121_v29, %v1238_v48  ;;  %v1241_v51 = vsub.f32 %v1126_v34, %v1238_v48  ;;  %v1242_v52 = vsub.f32 %v1131_v37, %v1238_v48 }
 0x5ee   :  { %v1243_v53 = vmul.f32 %v1239_v49, %v1239_v49  ;;  %v1244_v54 = vmul.f32 %v1240_v50, %v1240_v50  ;;  %v1245_v55 = vmul.f32 %v1241_v51, %v1241_v51  ;;  %v1246_v57 = vmul.f32 %v1242_v52, %v1242_v52 }
 0x5f0   :  { %v1247_v56 = vadd.f32 %v1244_v54, %v1243_v53 }
 0x5f2   :  { %v1248_v58 = vadd.f32 %v1247_v56, %v1245_v55 }
 0x5f4   :  { %v1249_v59 = vadd.f32 %v1248_v58, %v1246_v57 }
 0x5f6   :  { %v1250_v13 = vrot.slane %v1249_v59, 4 }
 0x5f8   :  { %v1251_v61 = vadd.f32 %v1250_v13, %v1249_v59 }
 0x5fa   :  { %v1252_v60 = vrot.slane %v1251_v61, 2 }
 0x5fc   :  { %v1253_v62 = vadd.f32 %v1252_v60, %v1251_v61 }
 0x5fe   :  { %v1254_v0 = vrot.slane %v1253_v62, 1 }
 0x600   :  { %v1255_v1 = vadd.f32 %v1254_v0, %v1253_v62 }
 0x602   :  { %1761 = vmatmul.mubr.f32.vlgmr.msra.gmra.mrb[10].mxu1 %v1255_v1 }
 0x6d5   :  { %v1322_v2 = vpop.f32.mrb[10].mxu1 }
 0x6d6   :  { %v1326_v31 = vmul.f32 0.001953125, %v1322_v2  ;;  %v1762_v4 = vpop.f32.mrb[11].mxu1 }
 0x6d8   :  { %v1328_v5 = vadd.f32 1e-05, %v1326_v31 }
 0x6da   :  { %2019 = vrsqrt.f32 %v1328_v5 }
 0x6e4   :  { %v2020_v6 = vpop.eup %2019 }
 0x6e5   :  { %v1330_v7 = vmul.f32 %v2020_v6, %v1327_v32 }
 0x6e7   :  { %v1335_v8 = vrot.slane %v1330_v7, %v2271_v45 }
 0x6e9   :  { %v1337_v10 = vmul.f32 %v1335_v8, %v1239_v49  ;;  %v1338_v12 = vmul.f32 %v1335_v8, %v1240_v50  ;;  %v1339_v14 = vmul.f32 %v1335_v8, %v1241_v51  ;;  %v1340_v15 = vmul.f32 %v1335_v8, %v1242_v52 }
 0x6eb   :  { %v1348_v16 = vadd.f32 %v1443_v9, %v1337_v10  ;;  %v1349_v17 = vadd.f32 %v1443_v9, %v1338_v12  ;;  %v1350_v18 = vadd.f32 %v1443_v9, %v1339_v14  ;;  %v1351_v19 = vadd.f32 %v1443_v9, %v1340_v15 }
 0x6ed   :  { %v1352_v20 = vmax.f32 %v1348_v16, 0.0  ;;  %v1353_v21 = vmax.f32 %v1349_v17, 0.0  ;;  %v1354_v22 = vmax.f32 %v1350_v18, 0.0  ;;  %v1355_v23 = vmax.f32 %v1351_v19, 0.0 }
 0x6ef   :  { %1356 = vst [vmem:[%s2665_s9] sm:$0xff] %v1352_v20  ;;  %1357 = vst [vmem:[%s2665_s9 + $0x8] sm:$0xff] %v1353_v21 }
 0x6f0   :  { %1358 = vst [vmem:[%s2665_s9 + $0x10] sm:$0xff] %v1354_v22  ;;  %1359 = vst [vmem:[%s2665_s9 + $0x18] sm:$0xff] %v1355_v23 }

</bundles_post_ra>
